<compile_context>
chip_gen: v7x
topology: tpu7x:2x2x1
jax: 0.10.0
libtpu: 0.0.40
codegen_flags: <defaults>
</compile_context>

<pallas_src>
import functools

import jax
import jax.numpy as jnp
from jax.experimental import pallas as pl
from jax.experimental.pallas import tpu as pltpu

K_PAD = 16  # fc1 contraction dim padded 5 -> 16 (bf16 sublane pack) for the MXU


def _make_kernel(bf16_epilogue):
    """Returns the fused MLP kernel; epilogue dtype chosen per TPU generation."""
    ep = jnp.bfloat16 if bf16_epilogue else jnp.float32

    def kernel(x_ref, w1_ref, w23_ref, b123_ref, w4_ref, b4_ref, o_ref):
        # x_ref: (K_PAD, TN) f32 tile -- batch along lanes. Rows 5..K_PAD-1 are
        # zero padding (and the matching w1 columns are zero), so they
        # contribute exactly 0 to the contraction.
        x = x_ref[...].astype(jnp.bfloat16)                     # (K_PAD, TN)

        def bias_relu(acc_f32, b):
            # acc is the f32 MXU accumulator; bias-add + ReLU run in bf16 on
            # v6e/v7x (bf16 VALU) and in f32 on v5e; result feeds the next
            # bf16 matmul.
            return jnp.maximum(acc_f32.astype(ep) + b, 0).astype(jnp.bfloat16)

        # fc1: (64, K_PAD) @ (K_PAD, TN) on the MXU, f32 accumulation.
        h = jnp.dot(w1_ref[...], x, preferred_element_type=jnp.float32)
        h = bias_relu(h, b123_ref[0])
        # drop_layer -> identity (eval mode)

        # fc2: (64, 64) @ (64, TN)
        h = jnp.dot(w23_ref[0], h, preferred_element_type=jnp.float32)
        h = bias_relu(h, b123_ref[1])

        # fc3
        h = jnp.dot(w23_ref[1], h, preferred_element_type=jnp.float32)
        h = bias_relu(h, b123_ref[2])

        # fc4: (2, 64) @ (64, TN) -> (2, TN); lane-dense output store, f32 bias.
        y = jnp.dot(w4_ref[...], h, preferred_element_type=jnp.float32) + b4_ref[...]
        o_ref[...] = y.astype(o_ref.dtype)

    return kernel


def use_bf16_epilogue():
    """bf16 bias/ReLU epilogues on chips with bf16 VALUs (v6e, v7x, ...)."""
    try:
        kind = jax.devices()[0].device_kind.lower()
    except Exception:  # pragma: no cover - be permissive about backends
        return True
    return not any(tag in kind for tag in ("v2", "v3", "v4", "v5"))


def rgb2norm_forward(x, params, *, tile_n=1024, bf16_epilogue=None):
    """x: (N, 5) float32. params: PyTorch-layout weights. Returns (N, 2)."""
    N, f_in = x.shape
    assert f_in == 5
    assert tile_n % 128 == 0
    if bf16_epilogue is None:
        bf16_epilogue = use_bf16_epilogue()

    # Keep the grid >= 2 steps when possible (feeds both v7x TensorCores and
    # lets the x-tile DMA double-buffer); shrink the tile instead of
    # collapsing the grid, but never below 256 lanes.
    while tile_n > 256 and pl.cdiv(N, tile_n) < 2:
        tile_n //= 2
    n_blocks = pl.cdiv(N, tile_n)
    # v7x: round the grid up to an even step count (one extra zero tile if
    # needed) so the "parallel" axis splits evenly across the 2 TensorCores.
    if n_blocks > 1 and n_blocks % 2 == 1:
        n_blocks += 1
    n_pad = n_blocks * tile_n

    # Layout plumbing in the wrapper: transpose, pad features 5 -> K_PAD and
    # batch N -> n_pad with zeros (padded columns compute garbage that is
    # sliced off; no in-kernel batch reductions exist to contaminate).
    x_t = jnp.pad(x.T, ((0, K_PAD - 5), (0, n_pad - N)))        # (K_PAD, n_pad) f32

    ep = jnp.bfloat16 if bf16_epilogue else jnp.float32
    # Weights in (out, in); all matmul operands bf16 (f32 accumulation).
    w1 = jnp.pad(params["w1"], ((0, 0), (0, K_PAD - 5))).astype(jnp.bfloat16)  # (64, K_PAD)
    w23 = jnp.stack([params["w2"], params["w3"]]).astype(jnp.bfloat16)         # (2, 64, 64)
    b123 = jnp.stack([params["b1"], params["b2"], params["b3"]]
                     ).reshape(3, 64, 1).astype(ep)                            # (3, 64, 1)
    w4 = params["w4"].astype(jnp.bfloat16)                                     # (2, 64)
    b4 = params["b4"].reshape(2, 1).astype(jnp.float32)                        # (2, 1)

    def full(a):
        nd = a.ndim
        # Whole-array block, same block every grid step (grid-invariant).
        return pl.BlockSpec(a.shape, lambda i, _nd=nd: (0,) * _nd)

    flops = 2 * n_pad * (K_PAD * 64 + 64 * 64 + 64 * 64 + 64 * 2)
    bytes_accessed = (n_pad * K_PAD * 4 + n_pad * 2 * 4            # x in, y out
                      + 64 * K_PAD * 2 + 2 * 64 * 64 * 2 + 2 * 64 * 2
                      + 3 * 64 * b123.dtype.itemsize + 2 * 4)

    out_t = pl.pallas_call(
        _make_kernel(bf16_epilogue),
        out_shape=jax.ShapeDtypeStruct((2, n_pad), x.dtype),
        grid_spec=pltpu.PrefetchScalarGridSpec(
            num_scalar_prefetch=0,
            grid=(n_blocks,),
            in_specs=[
                pl.BlockSpec((K_PAD, tile_n), lambda i: (0, i)),   # x tile
                full(w1), full(w23), full(b123), full(w4), full(b4),
            ],
            out_specs=pl.BlockSpec((2, tile_n), lambda i: (0, i)),
        ),
        compiler_params=pltpu.CompilerParams(
            dimension_semantics=("parallel",)),
        cost_estimate=pl.CostEstimate(
            flops=flops, transcendentals=0, bytes_accessed=bytes_accessed),
    )(x_t, w1, w23, b123, w4, b4)

    # Callers that can consume (2, N) directly should slice out_t themselves;
    # the transpose here is pure layout plumbing to match the module's (N, 2).
    return out_t[:, :N].T


def init_params(key):
    """nn.Linear-style init: W ~ U(-1/sqrt(fan_in), 1/sqrt(fan_in)), (out, in)."""
    dims = [(64, 5), (64, 64), (64, 64), (2, 64)]
    params = {}
    keys = jax.random.split(key, 2 * len(dims))
    for idx, (fan_out, fan_in) in enumerate(dims):
        bound = 1.0 / (fan_in ** 0.5)
        wk, bk = keys[2 * idx], keys[2 * idx + 1]
        params[f"w{idx + 1}"] = jax.random.uniform(
            wk, (fan_out, fan_in), jnp.float32, minval=-bound, maxval=bound)
        params[f"b{idx + 1}"] = jax.random.uniform(
            bk, (fan_out,), jnp.float32, minval=-bound, maxval=bound)
    return params


def reference_forward(x, params, *, bf16_epilogue):
    """Pure-JAX reference mirroring the kernel's numerics (bf16 MXU operands,
    f32 accumulation, generation-gated epilogue dtype, eval-mode dropout)."""
    bf = jnp.bfloat16
    ep = bf if bf16_epilogue else jnp.float32

    def layer(h_bf, w, b):
        acc = jnp.dot(h_bf, w.T.astype(bf), preferred_element_type=jnp.float32)
        return jnp.maximum(acc.astype(ep) + b.astype(ep), 0).astype(bf)

    # fc1's zero-padded K columns contribute exactly 0, so plain w1 matches.
    h = layer(x.astype(bf), params["w1"], params["b1"])
    h = layer(h, params["w2"], params["b2"])
    h = layer(h, params["w3"], params["b3"])
    y = jnp.dot(h, params["w4"].T.astype(bf),
                preferred_element_type=jnp.float32) + params["b4"]
    return y


if __name__ == "__main__":
    key = jax.random.PRNGKey(0)
    pkey, xkey = jax.random.split(key)

    params = init_params(pkey)

    # Batch of 5-feature points (e.g. RGB + 2 pixel coords). Deliberately NOT
    # a multiple of tile_n to exercise the wrapper-side padding path; gives a
    # 2-step grid at tile_n=1024 (even -> both v7x TCs busy).
    N = 2000
    x = jax.random.normal(xkey, (N, 5), dtype=jnp.float32)

    bf16_ep = use_bf16_epilogue()
    out = rgb2norm_forward(x, params, tile_n=1024, bf16_epilogue=bf16_ep)
    out = jax.block_until_ready(out)

    ref = reference_forward(x, params, bf16_epilogue=bf16_ep)
    assert out.shape == (N, 2)
    # bf16 operands + bf16 rounding at layer boundaries: allow a small slack.
    assert jnp.allclose(out, ref, atol=2e-3, rtol=2e-3), "mismatch vs JAX reference"

    print("KERNEL_OK")
</pallas_src>

<mosaic_0001>
module attributes {stable_mosaic.version = 11 : i64} {
  func.func @kernel(%arg0: i32, %arg1: memref<16x1024xf32, #tpu.memory_space<vmem>>, %arg2: memref<64x16xbf16, #tpu.memory_space<vmem>>, %arg3: memref<2x64x64xbf16, #tpu.memory_space<vmem>>, %arg4: memref<3x64x1xbf16, #tpu.memory_space<vmem>>, %arg5: memref<2x64xbf16, #tpu.memory_space<vmem>>, %arg6: memref<2x1xf32, #tpu.memory_space<vmem>>, %arg7: memref<2x1024xf32, #tpu.memory_space<vmem>>) attributes {dimension_semantics = [#tpu.dimension_semantics<parallel>], iteration_bounds = array<i64: 2>, scalar_prefetch = 0 : i64, scratch_operands = 0 : i64, tpu.core_type = #tpu.core_type<tc>, window_params = [{transform_indices = @transform_0, window_bounds = array<i64: 16, 1024>}, {pipeline_mode = #tpu.pipeline_mode<synchronous>, transform_indices = @transform_1, window_bounds = array<i64: 64, 16>}, {pipeline_mode = #tpu.pipeline_mode<synchronous>, transform_indices = @transform_2, window_bounds = array<i64: 2, 64, 64>}, {pipeline_mode = #tpu.pipeline_mode<synchronous>, transform_indices = @transform_3, window_bounds = array<i64: 3, 64, 1>}, {pipeline_mode = #tpu.pipeline_mode<synchronous>, transform_indices = @transform_4, window_bounds = array<i64: 2, 64>}, {pipeline_mode = #tpu.pipeline_mode<synchronous>, transform_indices = @transform_5, window_bounds = array<i64: 2, 1>}, {transform_indices = @transform_6, window_bounds = array<i64: 2, 1024>}]} {
    %c0 = arith.constant 0 : index
    %c0_0 = arith.constant 0 : index
    %0 = vector.load %arg1[%c0, %c0_0] : memref<16x1024xf32, #tpu.memory_space<vmem>>, vector<16x1024xf32>
    %1 = arith.truncf %0 : vector<16x1024xf32> to vector<16x1024xbf16>
    %c0_1 = arith.constant 0 : index
    %c0_2 = arith.constant 0 : index
    %2 = vector.load %arg2[%c0_1, %c0_2] : memref<64x16xbf16, #tpu.memory_space<vmem>>, vector<64x16xbf16>
    %cst = arith.constant dense<0.000000e+00> : vector<64x1024xf32>
    %3 = tpu.matmul %2, %1, %cst {dimension_numbers = #tpu.dot_dimension_numbers<[1], [0], [0], [1], [0, 0, 1, 1], [], []>} : vector<64x16xbf16>, vector<16x1024xbf16>, vector<64x1024xf32> -> vector<64x1024xf32>
    %c0_3 = arith.constant 0 : index
    %c0_4 = arith.constant 0 : index
    %c0_5 = arith.constant 0 : index
    %4 = vector.load %arg4[%c0_3, %c0_4, %c0_5] : memref<3x64x1xbf16, #tpu.memory_space<vmem>>, vector<1x64x1xbf16>
    %5 = vector.shape_cast %4 : vector<1x64x1xbf16> to vector<64x1xbf16>
    %6 = arith.truncf %3 : vector<64x1024xf32> to vector<64x1024xbf16>
    %7 = vector.broadcast %5 : vector<64x1xbf16> to vector<64x1024xbf16>
    %8 = arith.addf %6, %7 : vector<64x1024xbf16>
    %cst_6 = arith.constant 0.000000e+00 : bf16
    %9 = vector.broadcast %cst_6 : bf16 to vector<64x1024xbf16>
    %10 = arith.maximumf %8, %9 : vector<64x1024xbf16>
    %c0_7 = arith.constant 0 : index
    %c0_8 = arith.constant 0 : index
    %c0_9 = arith.constant 0 : index
    %11 = vector.load %arg3[%c0_7, %c0_8, %c0_9] : memref<2x64x64xbf16, #tpu.memory_space<vmem>>, vector<1x64x64xbf16>
    %12 = vector.shape_cast %11 : vector<1x64x64xbf16> to vector<64x64xbf16>
    %cst_10 = arith.constant dense<0.000000e+00> : vector<64x1024xf32>
    %13 = tpu.matmul %12, %10, %cst_10 {dimension_numbers = #tpu.dot_dimension_numbers<[1], [0], [0], [1], [0, 0, 1, 1], [], []>} : vector<64x64xbf16>, vector<64x1024xbf16>, vector<64x1024xf32> -> vector<64x1024xf32>
    %c1 = arith.constant 1 : index
    %c0_11 = arith.constant 0 : index
    %c0_12 = arith.constant 0 : index
    %14 = vector.load %arg4[%c1, %c0_11, %c0_12] : memref<3x64x1xbf16, #tpu.memory_space<vmem>>, vector<1x64x1xbf16>
    %15 = vector.shape_cast %14 : vector<1x64x1xbf16> to vector<64x1xbf16>
    %16 = arith.truncf %13 : vector<64x1024xf32> to vector<64x1024xbf16>
    %17 = vector.broadcast %15 : vector<64x1xbf16> to vector<64x1024xbf16>
    %18 = arith.addf %16, %17 : vector<64x1024xbf16>
    %cst_13 = arith.constant 0.000000e+00 : bf16
    %19 = vector.broadcast %cst_13 : bf16 to vector<64x1024xbf16>
    %20 = arith.maximumf %18, %19 : vector<64x1024xbf16>
    %c1_14 = arith.constant 1 : index
    %c0_15 = arith.constant 0 : index
    %c0_16 = arith.constant 0 : index
    %21 = vector.load %arg3[%c1_14, %c0_15, %c0_16] : memref<2x64x64xbf16, #tpu.memory_space<vmem>>, vector<1x64x64xbf16>
    %22 = vector.shape_cast %21 : vector<1x64x64xbf16> to vector<64x64xbf16>
    %cst_17 = arith.constant dense<0.000000e+00> : vector<64x1024xf32>
    %23 = tpu.matmul %22, %20, %cst_17 {dimension_numbers = #tpu.dot_dimension_numbers<[1], [0], [0], [1], [0, 0, 1, 1], [], []>} : vector<64x64xbf16>, vector<64x1024xbf16>, vector<64x1024xf32> -> vector<64x1024xf32>
    %c2 = arith.constant 2 : index
    %c0_18 = arith.constant 0 : index
    %c0_19 = arith.constant 0 : index
    %24 = vector.load %arg4[%c2, %c0_18, %c0_19] : memref<3x64x1xbf16, #tpu.memory_space<vmem>>, vector<1x64x1xbf16>
    %25 = vector.shape_cast %24 : vector<1x64x1xbf16> to vector<64x1xbf16>
    %26 = arith.truncf %23 : vector<64x1024xf32> to vector<64x1024xbf16>
    %27 = vector.broadcast %25 : vector<64x1xbf16> to vector<64x1024xbf16>
    %28 = arith.addf %26, %27 : vector<64x1024xbf16>
    %cst_20 = arith.constant 0.000000e+00 : bf16
    %29 = vector.broadcast %cst_20 : bf16 to vector<64x1024xbf16>
    %30 = arith.maximumf %28, %29 : vector<64x1024xbf16>
    %c0_21 = arith.constant 0 : index
    %c0_22 = arith.constant 0 : index
    %31 = vector.load %arg5[%c0_21, %c0_22] : memref<2x64xbf16, #tpu.memory_space<vmem>>, vector<2x64xbf16>
    %cst_23 = arith.constant dense<0.000000e+00> : vector<2x1024xf32>
    %32 = tpu.matmul %31, %30, %cst_23 {dimension_numbers = #tpu.dot_dimension_numbers<[1], [0], [0], [1], [0, 0, 1, 1], [], []>} : vector<2x64xbf16>, vector<64x1024xbf16>, vector<2x1024xf32> -> vector<2x1024xf32>
    %c0_24 = arith.constant 0 : index
    %c0_25 = arith.constant 0 : index
    %33 = vector.load %arg6[%c0_24, %c0_25] : memref<2x1xf32, #tpu.memory_space<vmem>>, vector<2x1xf32>
    %34 = vector.broadcast %33 : vector<2x1xf32> to vector<2x1024xf32>
    %35 = arith.addf %32, %34 : vector<2x1024xf32>
    %c0_26 = arith.constant 0 : index
    %c0_27 = arith.constant 0 : index
    %36 = vector.load %arg7[%c0_26, %c0_27] : memref<2x1024xf32, #tpu.memory_space<vmem>>, vector<2x1024xf32>
    tpu.vector_store %arg7[%c0_26, %c0_27], %35 {strides = array<i32>} : memref<2x1024xf32, #tpu.memory_space<vmem>>, vector<2x1024xf32>,
    return
  }
  func.func @transform_0(%arg0: i32) -> (i32, i32) {
    %c0_i32 = arith.constant 0 : i32
    %c0_i32_0 = arith.constant 0 : i32
    return %c0_i32, %arg0 : i32, i32
  }
  func.func @transform_1(%arg0: i32) -> (i32, i32) {
    %c0_i32 = arith.constant 0 : i32
    %c0_i32_0 = arith.constant 0 : i32
    %c0_i32_1 = arith.constant 0 : i32
    return %c0_i32, %c0_i32_0 : i32, i32
  }
  func.func @transform_2(%arg0: i32) -> (i32, i32, i32) {
    %c0_i32 = arith.constant 0 : i32
    %c0_i32_0 = arith.constant 0 : i32
    %c0_i32_1 = arith.constant 0 : i32
    %c0_i32_2 = arith.constant 0 : i32
    return %c0_i32, %c0_i32_0, %c0_i32_1 : i32, i32, i32
  }
  func.func @transform_3(%arg0: i32) -> (i32, i32, i32) {
    %c0_i32 = arith.constant 0 : i32
    %c0_i32_0 = arith.constant 0 : i32
    %c0_i32_1 = arith.constant 0 : i32
    %c0_i32_2 = arith.constant 0 : i32
    return %c0_i32, %c0_i32_0, %c0_i32_1 : i32, i32, i32
  }
  func.func @transform_4(%arg0: i32) -> (i32, i32) {
    %c0_i32 = arith.constant 0 : i32
    %c0_i32_0 = arith.constant 0 : i32
    %c0_i32_1 = arith.constant 0 : i32
    return %c0_i32, %c0_i32_0 : i32, i32
  }
  func.func @transform_5(%arg0: i32) -> (i32, i32) {
    %c0_i32 = arith.constant 0 : i32
    %c0_i32_0 = arith.constant 0 : i32
    %c0_i32_1 = arith.constant 0 : i32
    return %c0_i32, %c0_i32_0 : i32, i32
  }
  func.func @transform_6(%arg0: i32) -> (i32, i32) {
    %c0_i32 = arith.constant 0 : i32
    %c0_i32_0 = arith.constant 0 : i32
    return %c0_i32, %arg0 : i32, i32
  }
}

</mosaic_0001>

<bundles_post_ra>
// kernel: tpu_custom_call.1
= control target key start
LH: loop header
LB: loop body
LE: loop exit
PB: predicated region body
PF: predicated region fallthrough
CT: control target
= control target key end

     0   :  { %11 = vsyncpa [#allocation3], 0  ;;  %s3293_s0 = inlined_call_operand.hbm [shape: f32[16,2048], index: 0, kind: input, shape index: {}]   ;;  %s3294_s1 = inlined_call_operand.vmem [shape: bf16[64,16], index: 1, kind: input, shape index: {}]   ;;  %s3295_s2 = inlined_call_operand.vmem [shape: bf16[2,64,64], index: 2, kind: input, shape index: {}]   ;;  %s3296_s3 = inlined_call_operand.vmem [shape: bf16[3,64,1], index: 3, kind: input, shape index: {}]   ;;  %s3297_s4 = inlined_call_operand.vmem [shape: bf16[2,64], index: 4, kind: input, shape index: {}]   ;;  %s3298_s5 = inlined_call_operand.vmem [shape: f32[2,1], index: 5, kind: input, shape index: {}]   ;;  %s3299_s6 = inlined_call_operand.hbm [shape: f32[2,2048], index: 6, kind: output, shape index: {}]  }
   0x1   :  { %13 = vsyncpa [#allocation3 + $0x1], 0 }
   0x2   :  { %14 = vsyncpa [#allocation4], 0 }
   0x3   :  { %16 = vsyncpa [#allocation4 + $0x1], 0  ;;  %s2598_s21 = smov 0   ;;  %s2600_s22 = smov 0  }
   0x4   :  { %s2602_s23 = smov 0   ;;  %s2604_s24 = smov 0  }
   0x5 LB: > { %s2619_s25 = sadd.s32 4294967295, %s2553_s24   ;;  %s2275_s26 = sadd.s32 4294967294, %s2553_s24   ;;  %s2553_s24 = sphi %s2604_s24, %s3313_s24   ;;  %s2549_s23 = sphi %s2602_s23, %s3312_s23   ;;  %s2545_s22 = sphi %s2600_s22, %s3311_s22   ;;  %s2541_s21 = sphi %s2598_s21, %s3310_s21  }
   0x6   : > { %s2623_s27 = sadd.s32 1, %s2553_s24   ;;  %s29_s28 = sadd.s32 1, %s2549_s23 }
   0x7   : > { %s26_s29 = ssub.s32 %s2553_s24, %s2623_s27  ;;  %p36_p0 = scmp.ne.s32.totalorder %s2549_s23, %s2545_s22 }
   0x8   : > { %p27_p1 = scmp.eq.s32.totalorder %s26_s29, 0  ;;  %p37_p2 = scmp.eq.s32.totalorder %s2553_s24, 0 }
   0x9   : > { %p42_p3 = scmp.ne.s32.totalorder %s2545_s22, %s2541_s21  ;;  %p43_p4 = scmp.eq.s32.totalorder %s2619_s25, 0 }
   0xa   : > { %s2635_s30 = scalar_select %p27_p1, %s2549_s23, %s29_s28  }
   0xb   : > { %p2637_p5 = por %p37_p2, %p36_p0  ;;  %p2641_p6 = por %p43_p4, %p42_p3 }
   0xc   : > { %p171_p7 = scmp.eq.s32.totalorder %s2619_s25, 1  ;;  %p177_p8 = scmp.eq.s32.totalorder %s2275_s26, 1 }
   0xd   : > { %p2403_p10 = scmp.lt.s32.totalorder %s2553_s24, 2  ;;  %s212_s11 = sand.u32 1, %s2549_s23  }
   0xe   : > { %p2648_p11 = por %p171_p7, %p36_p0  ;;  %p2652_p12 = por %p177_p8, %p42_p3 }
   0xf   : > { %s2389_s12 = sshll.u32 %s2553_s24, 10  ;;  %s2278_s13 = sshll.u32 %s212_s11, 7 }
  0x10   : > { %s3303_s9 = scalar_select %p2648_p11, 1, 0 }
  0x11   : > { %s3304_s10 = scalar_select %p2652_p12, 1, 0 }
  0x12   : > { %s2661_s16 = scalar_lea.hbm %s3293_s0, %s2389_s12  ;;  %s216_s17 = scalar_lea.vmem [#allocation2], %s2278_s13 }
  0x13   : > { %s223_s18 = sshll.u32 %s216_s17, 4  ;;  %p2665_p13 = pnand %p2403_p10, %p2637_p5  ;;  %s2669_s18 = int_to_ptr.vmem [resolvable:$true] %s223_s18 }
  0x14   : > { %s2672_s20 = scalar_lea.sflag [#allocation3], %s212_s11  ;;  %s2457_s26 = scalar_lea.hbm %s2661_s16, 2048 }
  0x15   : > { %p2458_p1 = scmp.ne.s32.totalorder %s2661_s16, %s2457_s26  ;;  %p2459_p2 = pneg %p2665_p13 }
  0x16   : > { %s2462_s7 = scalar_lea.hbm %s3293_s0, 4096  ;;  %p2463_p5 = scmp.lt.u32.totalorder %s2661_s16, %s3293_s0 }
  0x17   : > { %p2460_p3 = pnand %p2459_p2, %p2458_p1  ;;  %p2464_p7 = scmp.lt.u32.totalorder %s2462_s7, %s2457_s26 }
  0x18   : > { %p2466_p10 = scmp.lt.u32.totalorder %s2457_s26, %s2661_s16 }
  0x19   : > { %p2461_p4 = pneg %p2460_p3  ;;  %p2465_p8 = por %p2464_p7, %p2463_p5 }
  0x1b   : > { %p2467_p9 = por %p2466_p10, %p2465_p8 }
  0x1d   : > { %p2468_p0 = pnand %p2467_p9, %p2461_p4 }
  0x1f   : > { %2471 = shalt.err (!%p2468_p0)
}
  0x20   : > { %s2472_s11 = scalar_lea.vmem %s2669_s18, 2048  ;;  %s2555_s14 = smov [#allocation2]  }
  0x21   : > { %p2473_p1 = scmp.ne.s32.totalorder %s2669_s18, %s2472_s11  ;;  %s2477_s15 = sshll.u32 %s2555_s14, 4  ;;  %s2478_s15 = int_to_ptr.vmem [resolvable:$false] %s2477_s15 }
  0x22   : > { %s2479_s17 = scalar_lea.vmem %s2478_s15, 4096  ;;  %p2480_p11 = scmp.lt.s32.totalorder %s2669_s18, %s2478_s15 }
  0x23   : > { %p2475_p3 = pnand %p2473_p1, %p2459_p2  ;;  %p2481_p5 = scmp.lt.s32.totalorder %s2479_s17, %s2472_s11 }
  0x25   : > { %p2476_p12 = pneg %p2475_p3  ;;  %p2482_p7 = por %p2481_p5, %p2480_p11 }
  0x27   : > { %p2483_p8 = pnand %p2482_p7, %p2476_p12 }
  0x29   : > { %2486 = shalt.err (!%p2483_p8)
}
  0x2a   : > { %s2556_s26 = smov 2048   ;;  %s2557_s28 = smov 1024  }
  0x2b   : > { %s2558_s29 = smov 64   ;;  %p231_p9 = scmp.lt.s32.totalorder %s2553_s24, 3 }
  0x2c   : > { %2398 = dma.hbm_to_vmem [thread:$0]  (!%p2665_p13), %s2661_s16, 2048, %s2669_s18, %s2672_s20, %s2556_s26, %s2557_s28, %s2558_s29  }
  0x2d   : > { %p3306_p0 = scmp.ge.s32.totalorder %s2553_s24, 1 }
  0x2f   : > { %p232_p2 = pnand %p3306_p0, %p231_p9 }
  0x30   : > { %s2704_s7 = sand.u32 (!%p232_p2), 1, %s2545_s22  }
  0x31   : > { %235 = sbr.rel (%p232_p2) target bundleno = 1080 (0x438), region = 44  ;;  %s2282_s12 = sshll.u32 (!%p232_p2), %s2704_s7, 7 }
  0x32   : > { %s238_s13 = scalar_lea.sflag (!%p232_p2), [#allocation3], %s2704_s7  ;;  %s2708_s11 = scalar_lea.vmem (!%p232_p2), [#allocation2], %s2282_s12 }
  0x38   : > { %2532 = dma.done.wait (%p2641_p6), %s238_s13, 2048  }
  0x39   : > { %2534 = vsyncadd (%p2641_p6), %s238_s13, 4294965248  ;;  %v2559_v0 = vmov 0   ;;  %v274_v1 = vld [vmem:[%s2708_s11 + $0x8] sm:$0xff]  ;;  %v276_v3 = vld [vmem:[%s2708_s11 + $0x18] sm:$0xff]  ;;  %vm325_vm0 = vcmask 130048   ;;  %v678_v56 = vlaneseq  ;;  %vm882_vm1 = vcmask 523264  }
  0x3a   : > { %370 = vmatprep.mubr.bf16.mxu0 %v2559_v0  ;;  %443 = vmatprep.mubr.bf16.mxu1 %v2559_v0  ;;  %v282_v2 = vld [vmem:[%s2708_s11 + $0x48] sm:$0xff]  ;;  %v284_v5 = vld [vmem:[%s2708_s11 + $0x58] sm:$0xff]  ;;  %v273_v6 = vld [vmem:[%s2708_s11] sm:$0xff]  ;;  %v2560_v54 = vmov 839922192   ;;  %s2283_s15 = sshll.u32 %s2704_s7, 4 }
  0x3b   : > { %2443 = vset.pattern.permute.xlu0 %v2559_v0  ;;  %2444 = vset.pattern.permute.xlu1 %v2559_v0  ;;  %v290_v4 = vpack.c.bf16 %v282_v2, %v274_v1  ;;  %v281_v7 = vld [vmem:[%s2708_s11 + $0x40] sm:$0xff]  ;;  %v292_v8 = vpack.c.bf16 %v284_v5, %v276_v3  ;;  %v275_v10 = vld [vmem:[%s2708_s11 + $0x10] sm:$0xff]  ;;  %v278_v14 = vld [vmem:[%s2708_s11 + $0x28] sm:$0xff]  ;;  %v676_v55 = vunpack.c.l.s4 %v2560_v54  ;;  %v2859_v58 = vshrl.u32 %v678_v56, 7  ;;  %s269_s17 = scalar_lea.vmem [#allocation5], %s2283_s15  ;;  %s2390_s26 = sshll.u32 %s2619_s25, 8 }
  0x3c   : > { %v289_v9 = vpack.c.bf16 %v281_v7, %v273_v6  ;;  %v283_v11 = vld [vmem:[%s2708_s11 + $0x50] sm:$0xff]  ;;  %v2729_v13 = vld [vmem:[%s3294_s1] sm:$0xff]   ;;  %v286_v15 = vld [vmem:[%s2708_s11 + $0x68] sm:$0xff]  ;;  %s2205_s28 = sshll.u32 %s269_s17, 4  ;;  %s3249_s13 = scalar_lea.hbm %s3299_s6, %s2390_s26  ;;  %s3251_s28 = int_to_ptr.vmem [resolvable:$true] %s2205_s28 }
  0x3d   : > { %338 = vmatprep.subr.bf16.mxu0 %v290_v4  ;;  %v291_v12 = vpack.c.bf16 %v283_v11, %v275_v10  ;;  %411 = vmatprep.subr.bf16.mxu1 %v292_v8  ;;  %v280_v16 = vld [vmem:[%s2708_s11 + $0x38] sm:$0xff]  ;;  %v294_v18 = vpack.c.bf16 %v286_v15, %v278_v14  ;;  %v277_v20 = vld [vmem:[%s2708_s11 + $0x20] sm:$0xff]  ;;  %v279_v22 = vld [vmem:[%s2708_s11 + $0x30] sm:$0xff]  ;;  %v677_v57 = vunpack.c.0.s8 %v676_v55  ;;  %s2487_s8 = scalar_lea.vmem %s3251_s28, 256  ;;  %p3307_p11 = scmp.ne.s32.totalorder %s3303_s9, 0 }
  0x3e   : > { %339 = vmatpush1.bf16.msra.mxu0 %v289_v9  ;;  %v288_v17 = vld [vmem:[%s2708_s11 + $0x78] sm:$0xff]  ;;  %v285_v21 = vld [vmem:[%s2708_s11 + $0x60] sm:$0xff]  ;;  %v287_v24 = vld [vmem:[%s2708_s11 + $0x70] sm:$0xff]  ;;  %s2191_s11 = scalar_lea.sflag [#allocation4], %s2704_s7  ;;  %p2488_p6 = scmp.ne.s32.totalorder %s3251_s28, %s2487_s8 }
  0x3f   : > { %412 = vmatpush1.bf16.msra.mxu1 %v291_v12  ;;  %v296_v19 = vpack.c.bf16 %v288_v17, %v280_v16  ;;  %v293_v23 = vpack.c.bf16 %v285_v21, %v277_v20  ;;  %484 = vmatprep.subr.bf16.mxu0 %v294_v18  ;;  %v295_v25 = vpack.c.bf16 %v287_v24, %v279_v22  ;;  %v630_v26 = vld [vmem:[%s3296_s3] sm:$0xf]  ;;  %v632_v27 = vld [vmem:[%s3296_s3 + $0x8] sm:$0xf]  ;;  %v631_v29 = vld [vmem:[%s3296_s3 + $0x4] sm:$0xf] }
  0x40   : > { %v2446_v28 = vld [vmem:[%s3294_s1 + $0x8] sm:$0xff]   ;;  %672 = vperm.xlu0 %2443, %v630_v26   ;;  %696 = vperm.xlu1 %2444, %v632_v27   ;;  %v634_v31 = vld [vmem:[%s3296_s3 + $0x10] sm:$0xf]  ;;  %v635_v33 = vld [vmem:[%s3296_s3 + $0x14] sm:$0xf]  ;;  %v2862_v60 = vsub.s32 %v677_v57, %v2859_v58  ;;  %p2489_p12 = pnand %p2488_p6, %p3307_p11  ;;  %s2562_s25 = smov [#allocation5]  }
  0x41   : > { %2288 = vmatmul.mubr.msk.bf16.vlgmr.msra.gmra.mrb[0].mxu0 %vm325_vm0, %v2729_v13  ;;  %557 = vmatprep.subr.bf16.mxu1 %v296_v19  ;;  %v633_v30 = vld [vmem:[%s3296_s3 + $0xc] sm:$0xf]  ;;  %v2447_v32 = vld [vmem:[%s3294_s1 + $0x10] sm:$0xff]   ;;  %v636_v34 = vld [vmem:[%s3296_s3 + $0x18] sm:$0xf]  ;;  %s2491_s16 = sshll.u32 %s2562_s25, 4  ;;  %s2492_s16 = int_to_ptr.vmem [resolvable:$false] %s2491_s16 }
  0x42   : > { %2292 = vmatmul.mubr.msk.bf16.vlgmr.msra.gmra.mrb[0].mxu1 %vm325_vm0, %v2729_v13  ;;  %485 = vmatpush1.bf16.msra.mxu0 %v293_v23  ;;  %v637_v35 = vld [vmem:[%s3296_s3 + $0x1c] sm:$0xf]  ;;  %v2328_v36 = vld [vmem:[%s3296_s3 + $0x20] sm:$0xf]  ;;  %v2329_v37 = vld [vmem:[%s3296_s3 + $0x24] sm:$0xf]  ;;  %p2490_p13 = pneg %p2489_p12  ;;  %p2494_p4 = scmp.lt.s32.totalorder %s3251_s28, %s2492_s16 }
  0x43   : > { %558 = vmatpush1.bf16.msra.mxu1 %v295_v25  ;;  %380 = vmatprep.mubr.bf16.mxu0 %v2559_v0  ;;  %v2448_v38 = vld [vmem:[%s3294_s1 + $0x18] sm:$0xff]   ;;  %v2330_v39 = vld [vmem:[%s3296_s3 + $0x28] sm:$0xf]  ;;  %v2331_v40 = vld [vmem:[%s3296_s3 + $0x2c] sm:$0xf]  ;;  %s2493_s18 = scalar_lea.vmem %s2492_s16, 512 }
  0x44   : > { %453 = vmatprep.mubr.bf16.mxu1 %v2559_v0  ;;  %684 = vperm.xlu0 %2443, %v631_v29   ;;  %v2332_v41 = vld [vmem:[%s3296_s3 + $0x30] sm:$0xf]  ;;  %v2333_v42 = vld [vmem:[%s3296_s3 + $0x34] sm:$0xf]  ;;  %v2334_v43 = vld [vmem:[%s3296_s3 + $0x38] sm:$0xf]  ;;  %p2495_p10 = scmp.lt.s32.totalorder %s2493_s18, %s2487_s8 }
  0x45   : > { %708 = vperm.xlu1 %2444, %v633_v30   ;;  %v2335_v44 = vld [vmem:[%s3296_s3 + $0x3c] sm:$0xf]  ;;  %v2368_v45 = vld [vmem:[%s3296_s3 + $0x40] sm:$0xf]  ;;  %v2369_v46 = vld [vmem:[%s3296_s3 + $0x44] sm:$0xf] }
  0x46   : > { %v2370_v47 = vld [vmem:[%s3296_s3 + $0x48] sm:$0xf]  ;;  %v2371_v48 = vld [vmem:[%s3296_s3 + $0x4c] sm:$0xf]  ;;  %v2372_v49 = vld [vmem:[%s3296_s3 + $0x50] sm:$0xf]  ;;  %p2496_p1 = por %p2495_p10, %p2494_p4 }
  0x47   : > { %v2373_v50 = vld [vmem:[%s3296_s3 + $0x54] sm:$0xf]  ;;  %v2374_v51 = vld [vmem:[%s3296_s3 + $0x58] sm:$0xf]  ;;  %v2375_v52 = vld [vmem:[%s3296_s3 + $0x5c] sm:$0xf] }
  0x48   : > { %720 = vperm.xlu0 %2443, %v634_v31   ;;  %v1971_v53 = vld [vmem:[%s3298_s5] sm:$0x3]  ;;  %p2497_p3 = pnand %p2496_p1, %p2490_p13 }
  0x49   : > { %2289 = vmatmul.mubr.msk.bf16.gmra.mrb[4].mxu0 %vm325_vm0, %v2446_v28  ;;  %732 = vperm.xlu1 %2444, %v635_v33  }
  0x4a   : > { %2293 = vmatmul.mubr.msk.bf16.gmra.mrb[4].mxu1 %vm325_vm0, %v2446_v28  ;;  %390 = vmatprep.mubr.bf16.mxu0 %v2559_v0 }
  0x4b   : > { %463 = vmatprep.mubr.bf16.mxu1 %v2559_v0 }
  0x4c   : > { %744 = vperm.xlu0 %2443, %v636_v34  }
  0x4d   : > { %756 = vperm.xlu1 %2444, %v637_v35  }
  0x50   : > { %1230 = vperm.xlu0 %2443, %v2328_v36  }
  0x51   : > { %2290 = vmatmul.mubr.msk.bf16.gmra.mrb[8].mxu0 %vm325_vm0, %v2447_v32  ;;  %1242 = vperm.xlu1 %2444, %v2329_v37  }
  0x52   : > { %2294 = vmatmul.mubr.msk.bf16.gmra.mrb[8].mxu1 %vm325_vm0, %v2447_v32  ;;  %400 = vmatprep.mubr.bf16.mxu0 %v2559_v0 }
  0x53   : > { %473 = vmatprep.mubr.bf16.mxu1 %v2559_v0 }
  0x54   : > { %1254 = vperm.xlu0 %2443, %v2330_v39  }
  0x55   : > { %1266 = vperm.xlu1 %2444, %v2331_v40  }
  0x58   : > { %1278 = vperm.xlu0 %2443, %v2332_v41  }
  0x59   : > { %2291 = vmatmul.mubr.msk.bf16.gmra.mrb[12].mxu0 %vm325_vm0, %v2448_v38  ;;  %1290 = vperm.xlu1 %2444, %v2333_v42  }
  0x5a   : > { %2295 = vmatmul.mubr.msk.bf16.gmra.mrb[12].mxu1 %vm325_vm0, %v2448_v38  ;;  %516 = vmatprep.mubr.bf16.mxu0 %v2559_v0 }
  0x5b   : > { %589 = vmatprep.mubr.bf16.mxu1 %v2559_v0 }
  0x5c   : > { %1302 = vperm.xlu0 %2443, %v2334_v43  }
  0x5d   : > { %1314 = vperm.xlu1 %2444, %v2335_v44  }
  0x60   : > { %1788 = vperm.xlu0 %2443, %v2368_v45  }
  0x61   : > { %2296 = vmatmul.mubr.msk.bf16.vlgmr.msra.gmra.mrb[16].mxu0 %vm325_vm0, %v2729_v13  ;;  %1800 = vperm.xlu1 %2444, %v2369_v46  }
  0x62   : > { %2300 = vmatmul.mubr.msk.bf16.vlgmr.msra.gmra.mrb[16].mxu1 %vm325_vm0, %v2729_v13  ;;  %526 = vmatprep.mubr.bf16.mxu0 %v2559_v0 }
  0x63   : > { %599 = vmatprep.mubr.bf16.mxu1 %v2559_v0 }
  0x64   : > { %1812 = vperm.xlu0 %2443, %v2370_v47  }
  0x65   : > { %1824 = vperm.xlu1 %2444, %v2371_v48  }
  0x68   : > { %1836 = vperm.xlu0 %2443, %v2372_v49  }
  0x69   : > { %2297 = vmatmul.mubr.msk.bf16.gmra.mrb[20].mxu0 %vm325_vm0, %v2446_v28  ;;  %1848 = vperm.xlu1 %2444, %v2373_v50  }
  0x6a   : > { %2301 = vmatmul.mubr.msk.bf16.gmra.mrb[20].mxu1 %vm325_vm0, %v2446_v28  ;;  %536 = vmatprep.mubr.bf16.mxu0 %v2559_v0 }
  0x6b   : > { %609 = vmatprep.mubr.bf16.mxu1 %v2559_v0 }
  0x6c   : > { %1860 = vperm.xlu0 %2443, %v2374_v51  }
  0x6d   : > { %1872 = vperm.xlu1 %2444, %v2375_v52  }
  0x70   : > { %1974 = vperm.xlu0 %2443, %v1971_v53  }
  0x71   : > { %2298 = vmatmul.mubr.msk.bf16.gmra.mrb[24].mxu0 %vm325_vm0, %v2447_v32 }
  0x72   : > { %2302 = vmatmul.mubr.msk.bf16.gmra.mrb[24].mxu1 %vm325_vm0, %v2447_v32  ;;  %546 = vmatprep.mubr.bf16.mxu0 %v2559_v0 }
  0x73   : > { %619 = vmatprep.mubr.bf16.mxu1 %v2559_v0 }
  0x79   : > { %2299 = vmatmul.mubr.msk.bf16.gmra.mrb[28].mxu0 %vm325_vm0, %v2448_v38 }
  0x7a   : > { %2303 = vmatmul.mubr.msk.bf16.gmra.mrb[28].mxu1 %vm325_vm0, %v2448_v38  ;;  %927 = vmatprep.mubr.bf16.mxu0 %v2559_v0 }
  0x7b   : > { %1000 = vmatprep.mubr.bf16.mxu1 %v2559_v0 }
  0xbf   : > { %v673_v59 = vpop.permute.xlu0 %672  ;;  %v697_v1 = vpop.permute.xlu1 %696 }
  0xc0   : > { %v681_v62 = vrot.slane %v673_v59, %v2862_v60  ;;  %v705_v15 = vrot.slane %v697_v1, %v2862_v60 }
  0xc3   : > { %v685_v61 = vpop.permute.xlu0 %684 }
  0xc4   : > { %v693_v63 = vrot.slane %v685_v61, %v2862_v60  ;;  %v709_v11 = vpop.permute.xlu1 %708 }
  0xc5   : > { %v717_v16 = vrot.slane %v709_v11, %v2862_v60 }
  0xc6   : > { %v2866_v3 = vcombine.low %v681_v62, %v693_v63 }
  0xc7   : > { %v2875_v24 = vcombine.low %v705_v15, %v717_v16  ;;  %v721_v40 = vpop.permute.xlu0 %720 }
  0xc8   : > { %v733_v41 = vpop.permute.xlu1 %732  ;;  %v729_v44 = vrot.slane %v721_v40, %v2862_v60 }
  0xc9   : > { %v741_v45 = vrot.slane %v733_v41, %v2862_v60 }
  0xcb   : > { %v2890_v56 = vcombine.low %v729_v44, %v741_v45 }
 0x114   : > { %v372_v2 = vpop.f32.mrb[0].mxu0 }
 0x115   : > { %v445_v4 = vpop.f32.mrb[0].mxu1  ;;  %v374_v5 = vpop.f32.mrb[1].mxu0 }
 0x116   : > { %v447_v6 = vpop.f32.mrb[1].mxu1  ;;  %v376_v7 = vpop.f32.mrb[2].mxu0 }
 0x117   : > { %v638_v8 = vpack.c.bf16 %v376_v7, %v372_v2  ;;  %v449_v9 = vpop.f32.mrb[2].mxu1  ;;  %v378_v10 = vpop.f32.mrb[3].mxu0 }
 0x118   : > { %v640_v12 = vpack.c.bf16 %v449_v9, %v445_v4  ;;  %v639_v13 = vpack.c.bf16 %v378_v10, %v374_v5  ;;  %v451_v14 = vpop.f32.mrb[3].mxu1  ;;  %v745_v5 = vpop.permute.xlu0 %744 }
 0x119   : > { %v790_v17 = vadd.bf16 %v2866_v3, %v638_v8  ;;  %v641_v18 = vpack.c.bf16 %v451_v14, %v447_v6  ;;  %v757_v6 = vpop.permute.xlu1 %756  ;;  %v753_v9 = vrot.slane %v745_v5, %v2862_v60 }
 0x11a   : > { %v792_v19 = vadd.bf16 %v2866_v3, %v640_v12  ;;  %v791_v20 = vadd.bf16 %v2866_v3, %v639_v13  ;;  %v765_v10 = vrot.slane %v757_v6, %v2862_v60 }
 0x11b   : > { %v793_v21 = vadd.bf16 %v2866_v3, %v641_v18  ;;  %v822_v25 = vmax.bf16 %v2559_v0, %v790_v17 }
 0x11c   : > { %v382_v22 = vpop.f32.mrb[4].mxu0  ;;  %v823_v23 = vmax.bf16 %v2559_v0, %v791_v20  ;;  %v824_v29 = vmax.bf16 %v2559_v0, %v792_v19 }
 0x11d   : > { %v455_v26 = vpop.f32.mrb[4].mxu1  ;;  %v384_v27 = vpop.f32.mrb[5].mxu0  ;;  %v825_v28 = vmax.bf16 %v2559_v0, %v793_v21  ;;  %v2902_v21 = vcombine.low %v753_v9, %v765_v10 }
 0x11e   : > { %v457_v30 = vpop.f32.mrb[5].mxu1  ;;  %v386_v31 = vpop.f32.mrb[6].mxu0  ;;  %895 = vmatprep.subr.bf16.mxu0 %v823_v23 }
 0x11f   : > { %v646_v32 = vpack.c.bf16 %v386_v31, %v382_v22  ;;  %v459_v33 = vpop.f32.mrb[6].mxu1  ;;  %968 = vmatprep.subr.bf16.mxu1 %v825_v28  ;;  %v388_v34 = vpop.f32.mrb[7].mxu0  ;;  %896 = vmatpush1.bf16.msra.mxu0 %v822_v25 }
 0x120   : > { %v648_v35 = vpack.c.bf16 %v459_v33, %v455_v26  ;;  %v647_v36 = vpack.c.bf16 %v388_v34, %v384_v27  ;;  %v461_v37 = vpop.f32.mrb[7].mxu1  ;;  %969 = vmatpush1.bf16.msra.mxu1 %v824_v29 }
 0x121   : > { %v798_v38 = vadd.bf16 %v2875_v24, %v646_v32  ;;  %v649_v39 = vpack.c.bf16 %v461_v37, %v457_v30 }
 0x122   : > { %v800_v42 = vadd.bf16 %v2875_v24, %v648_v35  ;;  %v799_v43 = vadd.bf16 %v2875_v24, %v647_v36 }
 0x123   : > { %v801_v46 = vadd.bf16 %v2875_v24, %v649_v39  ;;  %v830_v49 = vmax.bf16 %v2559_v0, %v798_v38 }
 0x124   : > { %v392_v47 = vpop.f32.mrb[8].mxu0  ;;  %v831_v48 = vmax.bf16 %v2559_v0, %v799_v43  ;;  %v832_v53 = vmax.bf16 %v2559_v0, %v800_v42  ;;  %v2915_v43 = vld [vmem:[%s3295_s2] sm:$0xff]  }
 0x125   : > { %v465_v50 = vpop.f32.mrb[8].mxu1  ;;  %v394_v51 = vpop.f32.mrb[9].mxu0  ;;  %v833_v52 = vmax.bf16 %v2559_v0, %v801_v46 }
 0x126   : > { %v467_v54 = vpop.f32.mrb[9].mxu1  ;;  %v396_v55 = vpop.f32.mrb[10].mxu0  ;;  %897 = vmatprep.subr.bf16.mxu0 %v831_v48 }
 0x127   : > { %v654_v57 = vpack.c.bf16 %v396_v55, %v392_v47  ;;  %v469_v59 = vpop.f32.mrb[10].mxu1  ;;  %970 = vmatprep.subr.bf16.mxu1 %v833_v52  ;;  %v398_v61 = vpop.f32.mrb[11].mxu0  ;;  %898 = vmatpush1.bf16.msra.mxu0 %v830_v49 }
 0x128   : > { %v656_v62 = vpack.c.bf16 %v469_v59, %v465_v50  ;;  %v655_v63 = vpack.c.bf16 %v398_v61, %v394_v51  ;;  %v471_v1 = vpop.f32.mrb[11].mxu1  ;;  %971 = vmatpush1.bf16.msra.mxu1 %v832_v53 }
 0x129   : > { %v806_v2 = vadd.bf16 %v2890_v56, %v654_v57  ;;  %v657_v4 = vpack.c.bf16 %v471_v1, %v467_v54 }
 0x12a   : > { %v808_v7 = vadd.bf16 %v2890_v56, %v656_v62  ;;  %v807_v8 = vadd.bf16 %v2890_v56, %v655_v63 }
 0x12b   : > { %v809_v11 = vadd.bf16 %v2890_v56, %v657_v4  ;;  %v838_v14 = vmax.bf16 %v2559_v0, %v806_v2  ;;  %v2934_v4 = vld [vmem:[%s3295_s2 + $0x8] sm:$0xff]  }
 0x12c   : > { %v402_v12 = vpop.f32.mrb[12].mxu0  ;;  %v839_v13 = vmax.bf16 %v2559_v0, %v807_v8  ;;  %v840_v18 = vmax.bf16 %v2559_v0, %v808_v7 }
 0x12d   : > { %v475_v15 = vpop.f32.mrb[12].mxu1  ;;  %v404_v16 = vpop.f32.mrb[13].mxu0  ;;  %v841_v17 = vmax.bf16 %v2559_v0, %v809_v11 }
 0x12e   : > { %v477_v19 = vpop.f32.mrb[13].mxu1  ;;  %v406_v20 = vpop.f32.mrb[14].mxu0  ;;  %899 = vmatprep.subr.bf16.mxu0 %v839_v13 }
 0x12f   : > { %v662_v22 = vpack.c.bf16 %v406_v20, %v402_v12  ;;  %v479_v23 = vpop.f32.mrb[14].mxu1  ;;  %972 = vmatprep.subr.bf16.mxu1 %v841_v17  ;;  %v408_v25 = vpop.f32.mrb[15].mxu0  ;;  %900 = vmatpush1.bf16.msra.mxu0 %v838_v14 }
 0x130   : > { %v664_v26 = vpack.c.bf16 %v479_v23, %v475_v15  ;;  %v663_v27 = vpack.c.bf16 %v408_v25, %v404_v16  ;;  %v481_v28 = vpop.f32.mrb[15].mxu1  ;;  %973 = vmatpush1.bf16.msra.mxu1 %v840_v18 }
 0x131   : > { %v814_v29 = vadd.bf16 %v2902_v21, %v662_v22  ;;  %v665_v30 = vpack.c.bf16 %v481_v28, %v477_v19 }
 0x132   : > { %v816_v31 = vadd.bf16 %v2902_v21, %v664_v26  ;;  %v815_v32 = vadd.bf16 %v2902_v21, %v663_v27  ;;  %v2953_v26 = vld [vmem:[%s3295_s2 + $0x10] sm:$0xff]  }
 0x133   : > { %v817_v33 = vadd.bf16 %v2902_v21, %v665_v30  ;;  %v846_v36 = vmax.bf16 %v2559_v0, %v814_v29 }
 0x134   : > { %v518_v34 = vpop.f32.mrb[16].mxu0  ;;  %v847_v35 = vmax.bf16 %v2559_v0, %v815_v32  ;;  %v848_v40 = vmax.bf16 %v2559_v0, %v816_v31 }
 0x135   : > { %v591_v37 = vpop.f32.mrb[16].mxu1  ;;  %v520_v38 = vpop.f32.mrb[17].mxu0  ;;  %v849_v39 = vmax.bf16 %v2559_v0, %v817_v33 }
 0x136   : > { %v593_v41 = vpop.f32.mrb[17].mxu1  ;;  %v522_v42 = vpop.f32.mrb[18].mxu0  ;;  %901 = vmatprep.subr.bf16.mxu0 %v847_v35 }
 0x137   : > { %v642_v44 = vpack.c.bf16 %v522_v42, %v518_v34  ;;  %v595_v45 = vpop.f32.mrb[18].mxu1  ;;  %974 = vmatprep.subr.bf16.mxu1 %v849_v39  ;;  %v524_v46 = vpop.f32.mrb[19].mxu0  ;;  %902 = vmatpush1.bf16.msra.mxu0 %v846_v36 }
 0x138   : > { %v644_v47 = vpack.c.bf16 %v595_v45, %v591_v37  ;;  %v643_v48 = vpack.c.bf16 %v524_v46, %v520_v38  ;;  %v597_v49 = vpop.f32.mrb[19].mxu1  ;;  %975 = vmatpush1.bf16.msra.mxu1 %v848_v40 }
 0x139   : > { %v794_v50 = vadd.bf16 %v2866_v3, %v642_v44  ;;  %v645_v51 = vpack.c.bf16 %v597_v49, %v593_v41 }
 0x13a   : > { %v796_v52 = vadd.bf16 %v2866_v3, %v644_v47  ;;  %v795_v53 = vadd.bf16 %v2866_v3, %v643_v48  ;;  %2312 = vmatmul.mubr.msk.bf16.vlgmr.msra.gmra.mrb[32].mxu0 %vm882_vm1, %v2915_v43  ;;  %v2452_v47 = vld [vmem:[%s3295_s2 + $0x18] sm:$0xff]  }
 0x13b   : > { %v797_v54 = vadd.bf16 %v2866_v3, %v645_v51  ;;  %2316 = vmatmul.mubr.msk.bf16.vlgmr.msra.gmra.mrb[32].mxu1 %vm882_vm1, %v2915_v43  ;;  %937 = vmatprep.mubr.bf16.mxu0 %v2559_v0  ;;  %v826_v59 = vmax.bf16 %v2559_v0, %v794_v50 }
 0x13c   : > { %v528_v55 = vpop.f32.mrb[20].mxu0  ;;  %v827_v57 = vmax.bf16 %v2559_v0, %v795_v53  ;;  %1010 = vmatprep.mubr.bf16.mxu1 %v2559_v0  ;;  %v828_v1 = vmax.bf16 %v2559_v0, %v796_v52 }
 0x13d   : > { %v601_v61 = vpop.f32.mrb[20].mxu1  ;;  %v530_v62 = vpop.f32.mrb[21].mxu0  ;;  %v829_v63 = vmax.bf16 %v2559_v0, %v797_v54 }
 0x13e   : > { %v603_v2 = vpop.f32.mrb[21].mxu1  ;;  %v532_v3 = vpop.f32.mrb[22].mxu0  ;;  %1041 = vmatprep.subr.bf16.mxu0 %v827_v57 }
 0x13f   : > { %v650_v5 = vpack.c.bf16 %v532_v3, %v528_v55  ;;  %v605_v6 = vpop.f32.mrb[22].mxu1  ;;  %1114 = vmatprep.subr.bf16.mxu1 %v829_v63  ;;  %v534_v7 = vpop.f32.mrb[23].mxu0  ;;  %1042 = vmatpush1.bf16.msra.mxu0 %v826_v59 }
 0x140   : > { %v652_v8 = vpack.c.bf16 %v605_v6, %v601_v61  ;;  %v651_v9 = vpack.c.bf16 %v534_v7, %v530_v62  ;;  %v607_v10 = vpop.f32.mrb[23].mxu1  ;;  %1115 = vmatpush1.bf16.msra.mxu1 %v828_v1 }
 0x141   : > { %v802_v11 = vadd.bf16 %v2875_v24, %v650_v5  ;;  %v653_v12 = vpack.c.bf16 %v607_v10, %v603_v2 }
 0x142   : > { %v804_v13 = vadd.bf16 %v2875_v24, %v652_v8  ;;  %v803_v14 = vadd.bf16 %v2875_v24, %v651_v9  ;;  %2313 = vmatmul.mubr.msk.bf16.gmra.mrb[36].mxu0 %vm882_vm1, %v2934_v4 }
 0x143   : > { %v805_v15 = vadd.bf16 %v2875_v24, %v653_v12  ;;  %2317 = vmatmul.mubr.msk.bf16.gmra.mrb[36].mxu1 %vm882_vm1, %v2934_v4  ;;  %947 = vmatprep.mubr.bf16.mxu0 %v2559_v0  ;;  %v834_v18 = vmax.bf16 %v2559_v0, %v802_v11 }
 0x144   : > { %v538_v16 = vpop.f32.mrb[24].mxu0  ;;  %v835_v17 = vmax.bf16 %v2559_v0, %v803_v14  ;;  %1020 = vmatprep.mubr.bf16.mxu1 %v2559_v0  ;;  %v836_v23 = vmax.bf16 %v2559_v0, %v804_v13 }
 0x145   : > { %v611_v19 = vpop.f32.mrb[24].mxu1  ;;  %v540_v20 = vpop.f32.mrb[25].mxu0  ;;  %v837_v22 = vmax.bf16 %v2559_v0, %v805_v15 }
 0x146   : > { %v613_v25 = vpop.f32.mrb[25].mxu1  ;;  %v542_v24 = vpop.f32.mrb[26].mxu0  ;;  %1043 = vmatprep.subr.bf16.mxu0 %v835_v17 }
 0x147   : > { %v658_v27 = vpack.c.bf16 %v542_v24, %v538_v16  ;;  %v615_v28 = vpop.f32.mrb[26].mxu1  ;;  %1116 = vmatprep.subr.bf16.mxu1 %v837_v22  ;;  %v544_v29 = vpop.f32.mrb[27].mxu0  ;;  %1044 = vmatpush1.bf16.msra.mxu0 %v834_v18 }
 0x148   : > { %v660_v30 = vpack.c.bf16 %v615_v28, %v611_v19  ;;  %v659_v31 = vpack.c.bf16 %v544_v29, %v540_v20  ;;  %v617_v32 = vpop.f32.mrb[27].mxu1  ;;  %1117 = vmatpush1.bf16.msra.mxu1 %v836_v23 }
 0x149   : > { %v810_v33 = vadd.bf16 %v2890_v56, %v658_v27  ;;  %v661_v34 = vpack.c.bf16 %v617_v32, %v613_v25 }
 0x14a   : > { %v812_v35 = vadd.bf16 %v2890_v56, %v660_v30  ;;  %v811_v36 = vadd.bf16 %v2890_v56, %v659_v31  ;;  %2314 = vmatmul.mubr.msk.bf16.gmra.mrb[40].mxu0 %vm882_vm1, %v2953_v26 }
 0x14b   : > { %v813_v37 = vadd.bf16 %v2890_v56, %v661_v34  ;;  %2318 = vmatmul.mubr.msk.bf16.gmra.mrb[40].mxu1 %vm882_vm1, %v2953_v26  ;;  %957 = vmatprep.mubr.bf16.mxu0 %v2559_v0  ;;  %v842_v40 = vmax.bf16 %v2559_v0, %v810_v33 }
 0x14c   : > { %v548_v38 = vpop.f32.mrb[28].mxu0  ;;  %v843_v39 = vmax.bf16 %v2559_v0, %v811_v36  ;;  %1030 = vmatprep.mubr.bf16.mxu1 %v2559_v0  ;;  %v844_v45 = vmax.bf16 %v2559_v0, %v812_v35 }
 0x14d   : > { %v621_v41 = vpop.f32.mrb[28].mxu1  ;;  %v550_v42 = vpop.f32.mrb[29].mxu0  ;;  %v845_v44 = vmax.bf16 %v2559_v0, %v813_v37 }
 0x14e   : > { %v623_v46 = vpop.f32.mrb[29].mxu1  ;;  %v552_v56 = vpop.f32.mrb[30].mxu0  ;;  %1045 = vmatprep.subr.bf16.mxu0 %v843_v39 }
 0x14f   : > { %v666_v48 = vpack.c.bf16 %v552_v56, %v548_v38  ;;  %v625_v49 = vpop.f32.mrb[30].mxu1  ;;  %1118 = vmatprep.subr.bf16.mxu1 %v845_v44  ;;  %v554_v50 = vpop.f32.mrb[31].mxu0  ;;  %1046 = vmatpush1.bf16.msra.mxu0 %v842_v40 }
 0x150   : > { %v668_v51 = vpack.c.bf16 %v625_v49, %v621_v41  ;;  %v667_v52 = vpack.c.bf16 %v554_v50, %v550_v42  ;;  %v627_v53 = vpop.f32.mrb[31].mxu1  ;;  %1119 = vmatpush1.bf16.msra.mxu1 %v844_v45 }
 0x151   : > { %v818_v54 = vadd.bf16 %v2902_v21, %v666_v48  ;;  %v669_v55 = vpack.c.bf16 %v627_v53, %v623_v46 }
 0x152   : > { %v820_v57 = vadd.bf16 %v2902_v21, %v668_v51  ;;  %v819_v59 = vadd.bf16 %v2902_v21, %v667_v52  ;;  %2315 = vmatmul.mubr.msk.bf16.gmra.mrb[44].mxu0 %vm882_vm1, %v2452_v47 }
 0x153   : > { %v821_v61 = vadd.bf16 %v2902_v21, %v669_v55  ;;  %2319 = vmatmul.mubr.msk.bf16.gmra.mrb[44].mxu1 %vm882_vm1, %v2452_v47  ;;  %1073 = vmatprep.mubr.bf16.mxu0 %v2559_v0  ;;  %v850_v63 = vmax.bf16 %v2559_v0, %v818_v54  ;;  %v1231_v21 = vpop.permute.xlu0 %1230 }
 0x154   : > { %v851_v62 = vmax.bf16 %v2559_v0, %v819_v59  ;;  %1146 = vmatprep.mubr.bf16.mxu1 %v2559_v0  ;;  %v852_v2 = vmax.bf16 %v2559_v0, %v820_v57  ;;  %v1239_v3 = vrot.slane %v1231_v21, %v2862_v60 }
 0x155   : > { %v853_v1 = vmax.bf16 %v2559_v0, %v821_v61 }
 0x156   : > { %1047 = vmatprep.subr.bf16.mxu0 %v851_v62 }
 0x157   : > { %1120 = vmatprep.subr.bf16.mxu1 %v853_v1  ;;  %1048 = vmatpush1.bf16.msra.mxu0 %v850_v63  ;;  %v1255_v19 = vpop.permute.xlu0 %1254 }
 0x158   : > { %1121 = vmatpush1.bf16.msra.mxu1 %v852_v2  ;;  %v1263_v25 = vrot.slane %v1255_v19, %v2862_v60 }
 0x15a   : > { %2320 = vmatmul.mubr.msk.bf16.vlgmr.msra.gmra.mrb[48].mxu0 %vm882_vm1, %v2915_v43 }
 0x15b   : > { %2324 = vmatmul.mubr.msk.bf16.vlgmr.msra.gmra.mrb[48].mxu1 %vm882_vm1, %v2915_v43  ;;  %1083 = vmatprep.mubr.bf16.mxu0 %v2559_v0  ;;  %v1243_v43 = vpop.permute.xlu1 %1242  ;;  %v1279_v46 = vpop.permute.xlu0 %1278 }
 0x15c   : > { %1156 = vmatprep.mubr.bf16.mxu1 %v2559_v0  ;;  %v1287_v49 = vrot.slane %v1279_v46, %v2862_v60 }
 0x15f   : > { %v1267_v20 = vpop.permute.xlu1 %1266 }
 0x160   : > { %v1275_v24 = vrot.slane %v1267_v20, %v2862_v60 }
 0x162   : > { %2321 = vmatmul.mubr.msk.bf16.gmra.mrb[52].mxu0 %vm882_vm1, %v2934_v4  ;;  %v3020_v36 = vcombine.low %v1263_v25, %v1275_v24 }
 0x163   : > { %2325 = vmatmul.mubr.msk.bf16.gmra.mrb[52].mxu1 %vm882_vm1, %v2934_v4  ;;  %1093 = vmatprep.mubr.bf16.mxu0 %v2559_v0  ;;  %v1251_v4 = vrot.slane %v1243_v43, %v2862_v60  ;;  %v1291_v56 = vpop.permute.xlu1 %1290 }
 0x164   : > { %1166 = vmatprep.mubr.bf16.mxu1 %v2559_v0  ;;  %v1299_v50 = vrot.slane %v1291_v56, %v2862_v60 }
 0x165   : > { %v3008_v10 = vcombine.low %v1239_v3, %v1251_v4 }
 0x166   : > { %v3032_v1 = vcombine.low %v1287_v49, %v1299_v50 }
 0x16a   : > { %2322 = vmatmul.mubr.msk.bf16.gmra.mrb[56].mxu0 %vm882_vm1, %v2953_v26 }
 0x16b   : > { %2326 = vmatmul.mubr.msk.bf16.gmra.mrb[56].mxu1 %vm882_vm1, %v2953_v26  ;;  %1103 = vmatprep.mubr.bf16.mxu0 %v2559_v0 }
 0x16c   : > { %1176 = vmatprep.mubr.bf16.mxu1 %v2559_v0 }
 0x172   : > { %2323 = vmatmul.mubr.msk.bf16.gmra.mrb[60].mxu0 %vm882_vm1, %v2452_v47 }
 0x173   : > { %2327 = vmatmul.mubr.msk.bf16.gmra.mrb[60].mxu1 %vm882_vm1, %v2452_v47  ;;  %1485 = vmatprep.mubr.bf16.mxu0 %v2559_v0 }
 0x174   : > { %1558 = vmatprep.mubr.bf16.mxu1 %v2559_v0 }
 0x20d   : > { %v929_v5 = vpop.f32.mrb[32].mxu0 }
 0x20e   : > { %v1002_v6 = vpop.f32.mrb[32].mxu1  ;;  %v931_v7 = vpop.f32.mrb[33].mxu0 }
 0x20f   : > { %v1004_v8 = vpop.f32.mrb[33].mxu1  ;;  %v933_v9 = vpop.f32.mrb[34].mxu0 }
 0x210   : > { %v1196_v11 = vpack.c.bf16 %v933_v9, %v929_v5  ;;  %v1006_v12 = vpop.f32.mrb[34].mxu1  ;;  %v935_v13 = vpop.f32.mrb[35].mxu0 }
 0x211   : > { %v1198_v14 = vpack.c.bf16 %v1006_v12, %v1002_v6  ;;  %v1197_v15 = vpack.c.bf16 %v935_v13, %v931_v7  ;;  %v1008_v16 = vpop.f32.mrb[35].mxu1  ;;  %v1315_v9 = vpop.permute.xlu1 %1314 }
 0x212   : > { %v1348_v17 = vadd.bf16 %v3008_v10, %v1196_v11  ;;  %v1199_v18 = vpack.c.bf16 %v1008_v16, %v1004_v8  ;;  %v1303_v8 = vpop.permute.xlu0 %1302 }
 0x213   : > { %v1350_v22 = vadd.bf16 %v3008_v10, %v1198_v14  ;;  %v1349_v23 = vadd.bf16 %v3008_v10, %v1197_v15  ;;  %v1311_v13 = vrot.slane %v1303_v8, %v2862_v60  ;;  %v1323_v14 = vrot.slane %v1315_v9, %v2862_v60 }
 0x214   : > { %v1351_v26 = vadd.bf16 %v3008_v10, %v1199_v18  ;;  %v1380_v29 = vmax.bf16 %v2559_v0, %v1348_v17 }
 0x215   : > { %v939_v27 = vpop.f32.mrb[36].mxu0  ;;  %v1381_v28 = vmax.bf16 %v2559_v0, %v1349_v23  ;;  %v1382_v33 = vmax.bf16 %v2559_v0, %v1350_v22 }
 0x216   : > { %v1012_v30 = vpop.f32.mrb[36].mxu1  ;;  %v941_v31 = vpop.f32.mrb[37].mxu0  ;;  %v1383_v32 = vmax.bf16 %v2559_v0, %v1351_v26  ;;  %v3044_v26 = vcombine.low %v1311_v13, %v1323_v14 }
 0x217   : > { %v1014_v34 = vpop.f32.mrb[37].mxu1  ;;  %v943_v35 = vpop.f32.mrb[38].mxu0  ;;  %1453 = vmatprep.subr.bf16.mxu0 %v1381_v28 }
 0x218   : > { %v1204_v37 = vpack.c.bf16 %v943_v35, %v939_v27  ;;  %v1016_v38 = vpop.f32.mrb[38].mxu1  ;;  %1526 = vmatprep.subr.bf16.mxu1 %v1383_v32  ;;  %v945_v39 = vpop.f32.mrb[39].mxu0  ;;  %1454 = vmatpush1.bf16.msra.mxu0 %v1380_v29 }
 0x219   : > { %v1206_v40 = vpack.c.bf16 %v1016_v38, %v1012_v30  ;;  %v1205_v41 = vpack.c.bf16 %v945_v39, %v941_v31  ;;  %v1018_v42 = vpop.f32.mrb[39].mxu1  ;;  %1527 = vmatpush1.bf16.msra.mxu1 %v1382_v33 }
 0x21a   : > { %v1356_v44 = vadd.bf16 %v3020_v36, %v1204_v37  ;;  %v1207_v45 = vpack.c.bf16 %v1018_v42, %v1014_v34 }
 0x21b   : > { %v1358_v47 = vadd.bf16 %v3020_v36, %v1206_v40  ;;  %v1357_v48 = vadd.bf16 %v3020_v36, %v1205_v41 }
 0x21c   : > { %v1359_v51 = vadd.bf16 %v3020_v36, %v1207_v45  ;;  %v1388_v54 = vmax.bf16 %v2559_v0, %v1356_v44 }
 0x21d   : > { %v949_v52 = vpop.f32.mrb[40].mxu0  ;;  %v1389_v53 = vmax.bf16 %v2559_v0, %v1357_v48  ;;  %v1390_v61 = vmax.bf16 %v2559_v0, %v1358_v47  ;;  %v3057_v48 = vld [vmem:[%s3295_s2 + $0x20] sm:$0xff]  }
 0x21e   : > { %v1022_v55 = vpop.f32.mrb[40].mxu1  ;;  %v951_v57 = vpop.f32.mrb[41].mxu0  ;;  %v1391_v59 = vmax.bf16 %v2559_v0, %v1359_v51 }
 0x21f   : > { %v1024_v62 = vpop.f32.mrb[41].mxu1  ;;  %v953_v63 = vpop.f32.mrb[42].mxu0  ;;  %1455 = vmatprep.subr.bf16.mxu0 %v1389_v53 }
 0x220   : > { %v1212_v2 = vpack.c.bf16 %v953_v63, %v949_v52  ;;  %v1026_v21 = vpop.f32.mrb[42].mxu1  ;;  %1528 = vmatprep.subr.bf16.mxu1 %v1391_v59  ;;  %v955_v43 = vpop.f32.mrb[43].mxu0  ;;  %1456 = vmatpush1.bf16.msra.mxu0 %v1388_v54 }
 0x221   : > { %v1214_v3 = vpack.c.bf16 %v1026_v21, %v1022_v55  ;;  %v1213_v4 = vpack.c.bf16 %v955_v43, %v951_v57  ;;  %v1028_v5 = vpop.f32.mrb[43].mxu1  ;;  %1529 = vmatpush1.bf16.msra.mxu1 %v1390_v61 }
 0x222   : > { %v1364_v6 = vadd.bf16 %v3032_v1, %v1212_v2  ;;  %v1215_v7 = vpack.c.bf16 %v1028_v5, %v1024_v62 }
 0x223   : > { %v1366_v11 = vadd.bf16 %v3032_v1, %v1214_v3  ;;  %v1365_v12 = vadd.bf16 %v3032_v1, %v1213_v4 }
 0x224   : > { %v1367_v15 = vadd.bf16 %v3032_v1, %v1215_v7  ;;  %v1396_v18 = vmax.bf16 %v2559_v0, %v1364_v6  ;;  %v3076_v7 = vld [vmem:[%s3295_s2 + $0x28] sm:$0xff]  }
 0x225   : > { %v959_v16 = vpop.f32.mrb[44].mxu0  ;;  %v1397_v17 = vmax.bf16 %v2559_v0, %v1365_v12  ;;  %v1398_v23 = vmax.bf16 %v2559_v0, %v1366_v11 }
 0x226   : > { %v1032_v19 = vpop.f32.mrb[44].mxu1  ;;  %v961_v20 = vpop.f32.mrb[45].mxu0  ;;  %v1399_v22 = vmax.bf16 %v2559_v0, %v1367_v15 }
 0x227   : > { %v1034_v25 = vpop.f32.mrb[45].mxu1  ;;  %v963_v24 = vpop.f32.mrb[46].mxu0  ;;  %1457 = vmatprep.subr.bf16.mxu0 %v1397_v17 }
 0x228   : > { %v1220_v27 = vpack.c.bf16 %v963_v24, %v959_v16  ;;  %v1036_v28 = vpop.f32.mrb[46].mxu1  ;;  %1530 = vmatprep.subr.bf16.mxu1 %v1399_v22  ;;  %v965_v29 = vpop.f32.mrb[47].mxu0  ;;  %1458 = vmatpush1.bf16.msra.mxu0 %v1396_v18 }
 0x229   : > { %v1222_v30 = vpack.c.bf16 %v1036_v28, %v1032_v19  ;;  %v1221_v31 = vpack.c.bf16 %v965_v29, %v961_v20  ;;  %v1038_v32 = vpop.f32.mrb[47].mxu1  ;;  %1531 = vmatpush1.bf16.msra.mxu1 %v1398_v23 }
 0x22a   : > { %v1372_v33 = vadd.bf16 %v3044_v26, %v1220_v27  ;;  %v1223_v34 = vpack.c.bf16 %v1038_v32, %v1034_v25 }
 0x22b   : > { %v1374_v35 = vadd.bf16 %v3044_v26, %v1222_v30  ;;  %v1373_v37 = vadd.bf16 %v3044_v26, %v1221_v31  ;;  %v3095_v30 = vld [vmem:[%s3295_s2 + $0x30] sm:$0xff]  }
 0x22c   : > { %v1375_v38 = vadd.bf16 %v3044_v26, %v1223_v34  ;;  %v1404_v41 = vmax.bf16 %v2559_v0, %v1372_v33 }
 0x22d   : > { %v1075_v39 = vpop.f32.mrb[48].mxu0  ;;  %v1405_v40 = vmax.bf16 %v2559_v0, %v1373_v37  ;;  %v1406_v46 = vmax.bf16 %v2559_v0, %v1374_v35 }
 0x22e   : > { %v1148_v42 = vpop.f32.mrb[48].mxu1  ;;  %v1077_v44 = vpop.f32.mrb[49].mxu0  ;;  %v1407_v45 = vmax.bf16 %v2559_v0, %v1375_v38 }
 0x22f   : > { %v1150_v56 = vpop.f32.mrb[49].mxu1  ;;  %v1079_v47 = vpop.f32.mrb[50].mxu0  ;;  %1459 = vmatprep.subr.bf16.mxu0 %v1405_v40 }
 0x230   : > { %v1200_v49 = vpack.c.bf16 %v1079_v47, %v1075_v39  ;;  %v1152_v50 = vpop.f32.mrb[50].mxu1  ;;  %1532 = vmatprep.subr.bf16.mxu1 %v1407_v45  ;;  %v1081_v51 = vpop.f32.mrb[51].mxu0  ;;  %1460 = vmatpush1.bf16.msra.mxu0 %v1404_v41 }
 0x231   : > { %v1202_v52 = vpack.c.bf16 %v1152_v50, %v1148_v42  ;;  %v1201_v53 = vpack.c.bf16 %v1081_v51, %v1077_v44  ;;  %v1154_v54 = vpop.f32.mrb[51].mxu1  ;;  %1533 = vmatpush1.bf16.msra.mxu1 %v1406_v46 }
 0x232   : > { %v1352_v55 = vadd.bf16 %v3008_v10, %v1200_v49  ;;  %v1203_v57 = vpack.c.bf16 %v1154_v54, %v1150_v56 }
 0x233   : > { %v1354_v59 = vadd.bf16 %v3008_v10, %v1202_v52  ;;  %v1353_v61 = vadd.bf16 %v3008_v10, %v1201_v53  ;;  %2352 = vmatmul.mubr.msk.bf16.vlgmr.msra.gmra.mrb[64].mxu0 %vm882_vm1, %v3057_v48  ;;  %v2456_v52 = vld [vmem:[%s3295_s2 + $0x38] sm:$0xff]  }
 0x234   : > { %v1355_v62 = vadd.bf16 %v3008_v10, %v1203_v57  ;;  %2356 = vmatmul.mubr.msk.bf16.vlgmr.msra.gmra.mrb[64].mxu1 %vm882_vm1, %v3057_v48  ;;  %1495 = vmatprep.mubr.bf16.mxu0 %v2559_v0  ;;  %v1384_v21 = vmax.bf16 %v2559_v0, %v1352_v55 }
 0x235   : > { %v1085_v63 = vpop.f32.mrb[52].mxu0  ;;  %v1385_v2 = vmax.bf16 %v2559_v0, %v1353_v61  ;;  %1568 = vmatprep.mubr.bf16.mxu1 %v2559_v0  ;;  %v1386_v5 = vmax.bf16 %v2559_v0, %v1354_v59 }
 0x236   : > { %v1158_v43 = vpop.f32.mrb[52].mxu1  ;;  %v1087_v3 = vpop.f32.mrb[53].mxu0  ;;  %v1387_v4 = vmax.bf16 %v2559_v0, %v1355_v62 }
 0x237   : > { %v1160_v6 = vpop.f32.mrb[53].mxu1  ;;  %v1089_v10 = vpop.f32.mrb[54].mxu0  ;;  %1599 = vmatprep.subr.bf16.mxu0 %v1385_v2 }
 0x238   : > { %v1208_v8 = vpack.c.bf16 %v1089_v10, %v1085_v63  ;;  %v1162_v9 = vpop.f32.mrb[54].mxu1  ;;  %1672 = vmatprep.subr.bf16.mxu1 %v1387_v4  ;;  %v1091_v11 = vpop.f32.mrb[55].mxu0  ;;  %1600 = vmatpush1.bf16.msra.mxu0 %v1384_v21 }
 0x239   : > { %v1210_v12 = vpack.c.bf16 %v1162_v9, %v1158_v43  ;;  %v1209_v13 = vpack.c.bf16 %v1091_v11, %v1087_v3  ;;  %v1164_v14 = vpop.f32.mrb[55].mxu1  ;;  %1673 = vmatpush1.bf16.msra.mxu1 %v1386_v5 }
 0x23a   : > { %v1360_v15 = vadd.bf16 %v3020_v36, %v1208_v8  ;;  %v1211_v16 = vpack.c.bf16 %v1164_v14, %v1160_v6 }
 0x23b   : > { %v1362_v17 = vadd.bf16 %v3020_v36, %v1210_v12  ;;  %v1361_v18 = vadd.bf16 %v3020_v36, %v1209_v13  ;;  %2353 = vmatmul.mubr.msk.bf16.gmra.mrb[68].mxu0 %vm882_vm1, %v3076_v7 }
 0x23c   : > { %v1363_v19 = vadd.bf16 %v3020_v36, %v1211_v16  ;;  %2357 = vmatmul.mubr.msk.bf16.gmra.mrb[68].mxu1 %vm882_vm1, %v3076_v7  ;;  %1505 = vmatprep.mubr.bf16.mxu0 %v2559_v0  ;;  %v1392_v23 = vmax.bf16 %v2559_v0, %v1360_v15 }
 0x23d   : > { %v1095_v20 = vpop.f32.mrb[56].mxu0  ;;  %v1393_v22 = vmax.bf16 %v2559_v0, %v1361_v18  ;;  %1578 = vmatprep.mubr.bf16.mxu1 %v2559_v0  ;;  %v1394_v28 = vmax.bf16 %v2559_v0, %v1362_v17 }
 0x23e   : > { %v1168_v25 = vpop.f32.mrb[56].mxu1  ;;  %v1097_v24 = vpop.f32.mrb[57].mxu0  ;;  %v1395_v27 = vmax.bf16 %v2559_v0, %v1363_v19 }
 0x23f   : > { %v1170_v29 = vpop.f32.mrb[57].mxu1  ;;  %v1099_v36 = vpop.f32.mrb[58].mxu0  ;;  %1601 = vmatprep.subr.bf16.mxu0 %v1393_v22 }
 0x240   : > { %v1216_v31 = vpack.c.bf16 %v1099_v36, %v1095_v20  ;;  %v1172_v32 = vpop.f32.mrb[58].mxu1  ;;  %1674 = vmatprep.subr.bf16.mxu1 %v1395_v27  ;;  %v1101_v33 = vpop.f32.mrb[59].mxu0  ;;  %1602 = vmatpush1.bf16.msra.mxu0 %v1392_v23 }
 0x241   : > { %v1218_v34 = vpack.c.bf16 %v1172_v32, %v1168_v25  ;;  %v1217_v35 = vpack.c.bf16 %v1101_v33, %v1097_v24  ;;  %v1174_v37 = vpop.f32.mrb[59].mxu1  ;;  %1675 = vmatpush1.bf16.msra.mxu1 %v1394_v28 }
 0x242   : > { %v1368_v38 = vadd.bf16 %v3032_v1, %v1216_v31  ;;  %v1219_v39 = vpack.c.bf16 %v1174_v37, %v1170_v29 }
 0x243   : > { %v1370_v40 = vadd.bf16 %v3032_v1, %v1218_v34  ;;  %v1369_v41 = vadd.bf16 %v3032_v1, %v1217_v35  ;;  %2354 = vmatmul.mubr.msk.bf16.gmra.mrb[72].mxu0 %vm882_vm1, %v3095_v30 }
 0x244   : > { %v1371_v42 = vadd.bf16 %v3032_v1, %v1219_v39  ;;  %2358 = vmatmul.mubr.msk.bf16.gmra.mrb[72].mxu1 %vm882_vm1, %v3095_v30  ;;  %1515 = vmatprep.mubr.bf16.mxu0 %v2559_v0  ;;  %v1400_v46 = vmax.bf16 %v2559_v0, %v1368_v38 }
 0x245   : > { %v1105_v44 = vpop.f32.mrb[60].mxu0  ;;  %v1401_v45 = vmax.bf16 %v2559_v0, %v1369_v41  ;;  %1588 = vmatprep.mubr.bf16.mxu1 %v2559_v0  ;;  %v1402_v50 = vmax.bf16 %v2559_v0, %v1370_v40 }
 0x246   : > { %v1178_v56 = vpop.f32.mrb[60].mxu1  ;;  %v1107_v47 = vpop.f32.mrb[61].mxu0  ;;  %v1403_v49 = vmax.bf16 %v2559_v0, %v1371_v42 }
 0x247   : > { %v1180_v51 = vpop.f32.mrb[61].mxu1  ;;  %v1109_v1 = vpop.f32.mrb[62].mxu0  ;;  %1603 = vmatprep.subr.bf16.mxu0 %v1401_v45 }
 0x248   : > { %v1224_v53 = vpack.c.bf16 %v1109_v1, %v1105_v44  ;;  %v1182_v54 = vpop.f32.mrb[62].mxu1  ;;  %1676 = vmatprep.subr.bf16.mxu1 %v1403_v49  ;;  %v1111_v55 = vpop.f32.mrb[63].mxu0  ;;  %1604 = vmatpush1.bf16.msra.mxu0 %v1400_v46 }
 0x249   : > { %v1226_v57 = vpack.c.bf16 %v1182_v54, %v1178_v56  ;;  %v1225_v59 = vpack.c.bf16 %v1111_v55, %v1107_v47  ;;  %v1184_v61 = vpop.f32.mrb[63].mxu1  ;;  %1677 = vmatpush1.bf16.msra.mxu1 %v1402_v50 }
 0x24a   : > { %v1376_v62 = vadd.bf16 %v3044_v26, %v1224_v53  ;;  %v1227_v63 = vpack.c.bf16 %v1184_v61, %v1180_v51 }
 0x24b   : > { %v1378_v2 = vadd.bf16 %v3044_v26, %v1226_v57  ;;  %v1377_v21 = vadd.bf16 %v3044_v26, %v1225_v59  ;;  %2355 = vmatmul.mubr.msk.bf16.gmra.mrb[76].mxu0 %vm882_vm1, %v2456_v52 }
 0x24c   : > { %v1379_v43 = vadd.bf16 %v3044_v26, %v1227_v63  ;;  %2359 = vmatmul.mubr.msk.bf16.gmra.mrb[76].mxu1 %vm882_vm1, %v2456_v52  ;;  %1631 = vmatprep.mubr.bf16.mxu0 %v2559_v0  ;;  %v1408_v4 = vmax.bf16 %v2559_v0, %v1376_v62  ;;  %v1789_v26 = vpop.permute.xlu0 %1788 }
 0x24d   : > { %v1409_v3 = vmax.bf16 %v2559_v0, %v1377_v21  ;;  %1704 = vmatprep.mubr.bf16.mxu1 %v2559_v0  ;;  %v1410_v6 = vmax.bf16 %v2559_v0, %v1378_v2  ;;  %v1797_v10 = vrot.slane %v1789_v26, %v2862_v60 }
 0x24e   : > { %v1411_v5 = vmax.bf16 %v2559_v0, %v1379_v43 }
 0x24f   : > { %1605 = vmatprep.subr.bf16.mxu0 %v1409_v3 }
 0x250   : > { %1678 = vmatprep.subr.bf16.mxu1 %v1411_v5  ;;  %1606 = vmatpush1.bf16.msra.mxu0 %v1408_v4  ;;  %v1813_v25 = vpop.permute.xlu0 %1812 }
 0x251   : > { %1679 = vmatpush1.bf16.msra.mxu1 %v1410_v6  ;;  %v1821_v29 = vrot.slane %v1813_v25, %v2862_v60 }
 0x253   : > { %2360 = vmatmul.mubr.msk.bf16.vlgmr.msra.gmra.mrb[80].mxu0 %vm882_vm1, %v3057_v48 }
 0x254   : > { %2364 = vmatmul.mubr.msk.bf16.vlgmr.msra.gmra.mrb[80].mxu1 %vm882_vm1, %v3057_v48  ;;  %1641 = vmatprep.mubr.bf16.mxu0 %v2559_v0  ;;  %v1801_v48 = vpop.permute.xlu1 %1800  ;;  %v1837_v51 = vpop.permute.xlu0 %1836 }
 0x255   : > { %1714 = vmatprep.mubr.bf16.mxu1 %v2559_v0  ;;  %v1845_v54 = vrot.slane %v1837_v51, %v2862_v60 }
 0x258   : > { %v1825_v24 = vpop.permute.xlu1 %1824 }
 0x259   : > { %v1833_v36 = vrot.slane %v1825_v24, %v2862_v60 }
 0x25b   : > { %2361 = vmatmul.mubr.msk.bf16.gmra.mrb[84].mxu0 %vm882_vm1, %v3076_v7  ;;  %v3162_v41 = vcombine.low %v1821_v29, %v1833_v36 }
 0x25c   : > { %2365 = vmatmul.mubr.msk.bf16.gmra.mrb[84].mxu1 %vm882_vm1, %v3076_v7  ;;  %1651 = vmatprep.mubr.bf16.mxu0 %v2559_v0  ;;  %v1809_v7 = vrot.slane %v1801_v48, %v2862_v60  ;;  %v1849_v1 = vpop.permute.xlu1 %1848 }
 0x25d   : > { %1724 = vmatprep.mubr.bf16.mxu1 %v2559_v0  ;;  %v1857_v55 = vrot.slane %v1849_v1, %v2862_v60 }
 0x25e   : > { %v3150_v14 = vcombine.low %v1797_v10, %v1809_v7 }
 0x25f   : > { %v3174_v5 = vcombine.low %v1845_v54, %v1857_v55  ;;  %v3199_v55 = vld [vmem:[%s3297_s4] sm:$0x1] }
 0x260   : > { %v1873_v10 = vpop.permute.xlu1 %1872 }
 0x263   : > { %2362 = vmatmul.mubr.msk.bf16.gmra.mrb[88].mxu0 %vm882_vm1, %v3095_v30 }
 0x264   : > { %2366 = vmatmul.mubr.msk.bf16.gmra.mrb[88].mxu1 %vm882_vm1, %v3095_v30  ;;  %1661 = vmatprep.mubr.bf16.mxu0 %v2559_v0 }
 0x265   : > { %1734 = vmatprep.mubr.bf16.mxu1 %v2559_v0 }
 0x26b   : > { %2363 = vmatmul.mubr.msk.bf16.gmra.mrb[92].mxu0 %vm882_vm1, %v2456_v52 }
 0x26c   : > { %2367 = vmatmul.mubr.msk.bf16.gmra.mrb[92].mxu1 %vm882_vm1, %v2456_v52  ;;  %2012 = vmatprep.mubr.bf16.mxu0 %v2559_v0 }
 0x26d   : > { %2053 = vmatprep.mubr.bf16.mxu1 %v2559_v0 }
 0x306   : > { %v1487_v8 = vpop.f32.mrb[64].mxu0 }
 0x307   : > { %v1560_v9 = vpop.f32.mrb[64].mxu1  ;;  %v1489_v11 = vpop.f32.mrb[65].mxu0 }
 0x308   : > { %v1562_v12 = vpop.f32.mrb[65].mxu1  ;;  %v1491_v13 = vpop.f32.mrb[66].mxu0 }
 0x309   : > { %v1754_v15 = vpack.c.bf16 %v1491_v13, %v1487_v8  ;;  %v1564_v16 = vpop.f32.mrb[66].mxu1  ;;  %v1493_v17 = vpop.f32.mrb[67].mxu0 }
 0x30a   : > { %v1756_v18 = vpack.c.bf16 %v1564_v16, %v1560_v9  ;;  %v1755_v19 = vpack.c.bf16 %v1493_v17, %v1489_v11  ;;  %v1566_v20 = vpop.f32.mrb[67].mxu1  ;;  %v1861_v13 = vpop.permute.xlu0 %1860 }
 0x30b   : > { %v1906_v22 = vadd.bf16 %v3150_v14, %v1754_v15  ;;  %v1757_v23 = vpack.c.bf16 %v1566_v20, %v1562_v12  ;;  %v1869_v17 = vrot.slane %v1861_v13, %v2862_v60 }
 0x30c   : > { %v1908_v27 = vadd.bf16 %v3150_v14, %v1756_v18  ;;  %v1907_v28 = vadd.bf16 %v3150_v14, %v1755_v19  ;;  %v1881_v18 = vrot.slane %v1873_v10, %v2862_v60 }
 0x30d   : > { %v1909_v30 = vadd.bf16 %v3150_v14, %v1757_v23  ;;  %v1938_v33 = vmax.bf16 %v2559_v0, %v1906_v22 }
 0x30e   : > { %v1497_v31 = vpop.f32.mrb[68].mxu0  ;;  %v1939_v32 = vmax.bf16 %v2559_v0, %v1907_v28  ;;  %v1940_v38 = vmax.bf16 %v2559_v0, %v1908_v27 }
 0x30f   : > { %v1570_v34 = vpop.f32.mrb[68].mxu1  ;;  %v1499_v35 = vpop.f32.mrb[69].mxu0  ;;  %v1941_v37 = vmax.bf16 %v2559_v0, %v1909_v30  ;;  %v3186_v30 = vcombine.low %v1869_v17, %v1881_v18 }
 0x310   : > { %v1572_v39 = vpop.f32.mrb[69].mxu1  ;;  %v1501_v40 = vpop.f32.mrb[70].mxu0  ;;  %1980 = vmatprep.subr.bf16.mxu0 %v1939_v32 }
 0x311   : > { %v1762_v42 = vpack.c.bf16 %v1501_v40, %v1497_v31  ;;  %v1574_v44 = vpop.f32.mrb[70].mxu1  ;;  %2021 = vmatprep.subr.bf16.mxu1 %v1941_v37  ;;  %v1503_v45 = vpop.f32.mrb[71].mxu0  ;;  %1981 = vmatpush1.bf16.msra.mxu0 %v1938_v33 }
 0x312   : > { %v1764_v46 = vpack.c.bf16 %v1574_v44, %v1570_v34  ;;  %v1763_v56 = vpack.c.bf16 %v1503_v45, %v1499_v35  ;;  %v1576_v47 = vpop.f32.mrb[71].mxu1  ;;  %2022 = vmatpush1.bf16.msra.mxu1 %v1940_v38 }
 0x313   : > { %v1914_v49 = vadd.bf16 %v3162_v41, %v1762_v42  ;;  %v1765_v50 = vpack.c.bf16 %v1576_v47, %v1572_v39 }
 0x314   : > { %v1916_v52 = vadd.bf16 %v3162_v41, %v1764_v46  ;;  %v1915_v53 = vadd.bf16 %v3162_v41, %v1763_v56 }
 0x315   : > { %v1917_v57 = vadd.bf16 %v3162_v41, %v1765_v50  ;;  %v1946_v62 = vmax.bf16 %v2559_v0, %v1914_v49 }
 0x316   : > { %v1507_v59 = vpop.f32.mrb[72].mxu0  ;;  %v1947_v61 = vmax.bf16 %v2559_v0, %v1915_v53  ;;  %v1948_v43 = vmax.bf16 %v2559_v0, %v1916_v52 }
 0x317   : > { %v1580_v63 = vpop.f32.mrb[72].mxu1  ;;  %v1509_v2 = vpop.f32.mrb[73].mxu0  ;;  %v1949_v21 = vmax.bf16 %v2559_v0, %v1917_v57 }
 0x318   : > { %v1582_v3 = vpop.f32.mrb[73].mxu1  ;;  %v1511_v4 = vpop.f32.mrb[74].mxu0  ;;  %1982 = vmatprep.subr.bf16.mxu0 %v1947_v61 }
 0x319   : > { %v1770_v6 = vpack.c.bf16 %v1511_v4, %v1507_v59  ;;  %v1584_v26 = vpop.f32.mrb[74].mxu1  ;;  %2023 = vmatprep.subr.bf16.mxu1 %v1949_v21  ;;  %v1513_v48 = vpop.f32.mrb[75].mxu0  ;;  %1983 = vmatpush1.bf16.msra.mxu0 %v1946_v62 }
 0x31a   : > { %v1772_v7 = vpack.c.bf16 %v1584_v26, %v1580_v63  ;;  %v1771_v8 = vpack.c.bf16 %v1513_v48, %v1509_v2  ;;  %v1586_v9 = vpop.f32.mrb[75].mxu1  ;;  %2024 = vmatpush1.bf16.msra.mxu1 %v1948_v43 }
 0x31b   : > { %v1922_v11 = vadd.bf16 %v3174_v5, %v1770_v6  ;;  %v1773_v12 = vpack.c.bf16 %v1586_v9, %v1582_v3 }
 0x31c   : > { %v1924_v15 = vadd.bf16 %v3174_v5, %v1772_v7  ;;  %v1923_v16 = vadd.bf16 %v3174_v5, %v1771_v8 }
 0x31d   : > { %v1925_v19 = vadd.bf16 %v3174_v5, %v1773_v12  ;;  %v1954_v23 = vmax.bf16 %v2559_v0, %v1922_v11 }
 0x31e   : > { %v1517_v20 = vpop.f32.mrb[76].mxu0  ;;  %v1955_v22 = vmax.bf16 %v2559_v0, %v1923_v16  ;;  %v1956_v28 = vmax.bf16 %v2559_v0, %v1924_v15 }
 0x31f   : > { %v1590_v25 = vpop.f32.mrb[76].mxu1  ;;  %v1519_v24 = vpop.f32.mrb[77].mxu0  ;;  %v1957_v27 = vmax.bf16 %v2559_v0, %v1925_v19 }
 0x320   : > { %v1592_v29 = vpop.f32.mrb[77].mxu1  ;;  %v1521_v36 = vpop.f32.mrb[78].mxu0  ;;  %1984 = vmatprep.subr.bf16.mxu0 %v1955_v22 }
 0x321   : > { %v1778_v31 = vpack.c.bf16 %v1521_v36, %v1517_v20  ;;  %v1594_v60 = vpop.f32.mrb[78].mxu1  ;;  %2025 = vmatprep.subr.bf16.mxu1 %v1957_v27  ;;  %v1523_v32 = vpop.f32.mrb[79].mxu0  ;;  %1985 = vmatpush1.bf16.msra.mxu0 %v1954_v23 }
 0x322   : > { %v1780_v33 = vpack.c.bf16 %v1594_v60, %v1590_v25  ;;  %v1779_v34 = vpack.c.bf16 %v1523_v32, %v1519_v24  ;;  %v1596_v35 = vpop.f32.mrb[79].mxu1  ;;  %2026 = vmatpush1.bf16.msra.mxu1 %v1956_v28 }
 0x323   : > { %v1930_v37 = vadd.bf16 %v3186_v30, %v1778_v31  ;;  %v1781_v38 = vpack.c.bf16 %v1596_v35, %v1592_v29 }
 0x324   : > { %v1932_v39 = vadd.bf16 %v3186_v30, %v1780_v33  ;;  %v1931_v40 = vadd.bf16 %v3186_v30, %v1779_v34 }
 0x325   : > { %v1933_v42 = vadd.bf16 %v3186_v30, %v1781_v38  ;;  %v1962_v46 = vmax.bf16 %v2559_v0, %v1930_v37 }
 0x326   : > { %v1633_v44 = vpop.f32.mrb[80].mxu0  ;;  %v1963_v45 = vmax.bf16 %v2559_v0, %v1931_v40  ;;  %v1964_v50 = vmax.bf16 %v2559_v0, %v1932_v39 }
 0x327   : > { %v1706_v56 = vpop.f32.mrb[80].mxu1  ;;  %v1635_v47 = vpop.f32.mrb[81].mxu0  ;;  %v1965_v49 = vmax.bf16 %v2559_v0, %v1933_v42 }
 0x328   : > { %v1708_v51 = vpop.f32.mrb[81].mxu1  ;;  %v1637_v1 = vpop.f32.mrb[82].mxu0  ;;  %1986 = vmatprep.subr.bf16.mxu0 %v1963_v45 }
 0x329   : > { %v1758_v52 = vpack.c.bf16 %v1637_v1, %v1633_v44  ;;  %v1710_v53 = vpop.f32.mrb[82].mxu1  ;;  %2027 = vmatprep.subr.bf16.mxu1 %v1965_v49  ;;  %v1639_v54 = vpop.f32.mrb[83].mxu0  ;;  %1987 = vmatpush1.bf16.msra.mxu0 %v1962_v46 }
 0x32a   : > { %v1760_v57 = vpack.c.bf16 %v1710_v53, %v1706_v56  ;;  %v1759_v59 = vpack.c.bf16 %v1639_v54, %v1635_v47  ;;  %v1712_v61 = vpop.f32.mrb[83].mxu1  ;;  %2028 = vmatpush1.bf16.msra.mxu1 %v1964_v50 }
 0x32b   : > { %v1910_v62 = vadd.bf16 %v3150_v14, %v1758_v52  ;;  %v1761_v63 = vpack.c.bf16 %v1712_v61, %v1708_v51 }
 0x32c   : > { %v1912_v2 = vadd.bf16 %v3150_v14, %v1760_v57  ;;  %v1911_v21 = vadd.bf16 %v3150_v14, %v1759_v59  ;;  %2380 = vmatmul.mubr.msk.bf16.vlgmr.msra.gmra.mrb[96].mxu0 %vm882_vm1, %v3199_v55 }
 0x32d   : > { %v1913_v43 = vadd.bf16 %v3150_v14, %v1761_v63  ;;  %2381 = vmatmul.mubr.msk.bf16.vlgmr.msra.gmra.mrb[96].mxu1 %vm882_vm1, %v3199_v55  ;;  %2094 = vmatprep.mubr.bf16.mxu0 %v2559_v0  ;;  %v1942_v6 = vmax.bf16 %v2559_v0, %v1910_v62 }
 0x32e   : > { %v1643_v3 = vpop.f32.mrb[84].mxu0  ;;  %v1943_v4 = vmax.bf16 %v2559_v0, %v1911_v21  ;;  %2135 = vmatprep.mubr.bf16.mxu1 %v2559_v0  ;;  %v1944_v7 = vmax.bf16 %v2559_v0, %v1912_v2 }
 0x32f   : > { %v1716_v26 = vpop.f32.mrb[84].mxu1  ;;  %v1645_v48 = vpop.f32.mrb[85].mxu0  ;;  %v1945_v10 = vmax.bf16 %v2559_v0, %v1913_v43 }
 0x330   : > { %v1718_v8 = vpop.f32.mrb[85].mxu1  ;;  %v1647_v14 = vpop.f32.mrb[86].mxu0  ;;  %2062 = vmatprep.subr.bf16.mxu0 %v1943_v4 }
 0x331   : > { %v1766_v9 = vpack.c.bf16 %v1647_v14, %v1643_v3  ;;  %v1720_v11 = vpop.f32.mrb[86].mxu1  ;;  %2103 = vmatprep.subr.bf16.mxu1 %v1945_v10  ;;  %v1649_v12 = vpop.f32.mrb[87].mxu0  ;;  %2063 = vmatpush1.bf16.msra.mxu0 %v1942_v6 }
 0x332   : > { %v1768_v13 = vpack.c.bf16 %v1720_v11, %v1716_v26  ;;  %v1767_v15 = vpack.c.bf16 %v1649_v12, %v1645_v48  ;;  %v1722_v16 = vpop.f32.mrb[87].mxu1  ;;  %2104 = vmatpush1.bf16.msra.mxu1 %v1944_v7  ;;  %v2561_v48 = vmov 1983009808   ;;  %v1975_v7 = vpop.permute.xlu0 %1974 }
 0x333   : > { %v1918_v17 = vadd.bf16 %v3162_v41, %v1766_v9  ;;  %v1769_v18 = vpack.c.bf16 %v1722_v16, %v1718_v8 }
 0x334   : > { %v1920_v19 = vadd.bf16 %v3162_v41, %v1768_v13  ;;  %v1919_v20 = vadd.bf16 %v3162_v41, %v1767_v15 }
 0x335   : > { %v1921_v22 = vadd.bf16 %v3162_v41, %v1769_v18  ;;  %v1950_v24 = vmax.bf16 %v2559_v0, %v1918_v17 }
 0x336   : > { %v1653_v23 = vpop.f32.mrb[88].mxu0  ;;  %v1951_v25 = vmax.bf16 %v2559_v0, %v1919_v20  ;;  %v1952_v36 = vmax.bf16 %v2559_v0, %v1920_v19 }
 0x337   : > { %v1726_v27 = vpop.f32.mrb[88].mxu1  ;;  %v1655_v28 = vpop.f32.mrb[89].mxu0  ;;  %v1953_v29 = vmax.bf16 %v2559_v0, %v1921_v22 }
 0x338   : > { %v1728_v31 = vpop.f32.mrb[89].mxu1  ;;  %v1657_v60 = vpop.f32.mrb[90].mxu0  ;;  %2064 = vmatprep.subr.bf16.mxu0 %v1951_v25 }
 0x339   : > { %v1774_v32 = vpack.c.bf16 %v1657_v60, %v1653_v23  ;;  %v1730_v33 = vpop.f32.mrb[90].mxu1  ;;  %2105 = vmatprep.subr.bf16.mxu1 %v1953_v29  ;;  %v1659_v34 = vpop.f32.mrb[91].mxu0  ;;  %2065 = vmatpush1.bf16.msra.mxu0 %v1950_v24 }
 0x33a   : > { %v1776_v41 = vpack.c.bf16 %v1730_v33, %v1726_v27  ;;  %v1775_v35 = vpack.c.bf16 %v1659_v34, %v1655_v28  ;;  %v1732_v37 = vpop.f32.mrb[91].mxu1  ;;  %2106 = vmatpush1.bf16.msra.mxu1 %v1952_v36 }
 0x33b   : > { %v1926_v38 = vadd.bf16 %v3174_v5, %v1774_v32  ;;  %v1777_v39 = vpack.c.bf16 %v1732_v37, %v1728_v31 }
 0x33c   : > { %v1928_v40 = vadd.bf16 %v3174_v5, %v1776_v41  ;;  %v1927_v42 = vadd.bf16 %v3174_v5, %v1775_v35 }
 0x33d   : > { %v1929_v44 = vadd.bf16 %v3174_v5, %v1777_v39  ;;  %v1958_v56 = vmax.bf16 %v2559_v0, %v1926_v38 }
 0x33e   : > { %v1663_v45 = vpop.f32.mrb[92].mxu0  ;;  %v1959_v46 = vmax.bf16 %v2559_v0, %v1927_v42  ;;  %v1960_v51 = vmax.bf16 %v2559_v0, %v1928_v40 }
 0x33f   : > { %v1736_v47 = vpop.f32.mrb[92].mxu1  ;;  %v1665_v49 = vpop.f32.mrb[93].mxu0  ;;  %v1961_v50 = vmax.bf16 %v2559_v0, %v1929_v44 }
 0x340   : > { %v1738_v1 = vpop.f32.mrb[93].mxu1  ;;  %v1667_v52 = vpop.f32.mrb[94].mxu0  ;;  %2066 = vmatprep.subr.bf16.mxu0 %v1959_v46 }
 0x341   : > { %v1782_v53 = vpack.c.bf16 %v1667_v52, %v1663_v45  ;;  %v1740_v54 = vpop.f32.mrb[94].mxu1  ;;  %2107 = vmatprep.subr.bf16.mxu1 %v1961_v50  ;;  %v1669_v57 = vpop.f32.mrb[95].mxu0  ;;  %2067 = vmatpush1.bf16.msra.mxu0 %v1958_v56 }
 0x342   : > { %v1784_v5 = vpack.c.bf16 %v1740_v54, %v1736_v47  ;;  %v1783_v59 = vpack.c.bf16 %v1669_v57, %v1665_v49  ;;  %v1742_v61 = vpop.f32.mrb[95].mxu1  ;;  %2108 = vmatpush1.bf16.msra.mxu1 %v1960_v51 }
 0x343   : > { %v1934_v62 = vadd.bf16 %v3186_v30, %v1782_v53  ;;  %v1785_v63 = vpack.c.bf16 %v1742_v61, %v1738_v1 }
 0x344   : > { %v1936_v2 = vadd.bf16 %v3186_v30, %v1784_v5  ;;  %v1935_v21 = vadd.bf16 %v3186_v30, %v1783_v59 }
 0x345   : > { %v1937_v43 = vadd.bf16 %v3186_v30, %v1785_v63  ;;  %v1966_v4 = vmax.bf16 %v2559_v0, %v1934_v62  ;;  %v2155_v30 = vunpack.c.l.s4 %v2561_v48 }
 0x346   : > { %v1967_v3 = vmax.bf16 %v2559_v0, %v1935_v21  ;;  %v1968_v26 = vmax.bf16 %v2559_v0, %v1936_v2 }
 0x347   : > { %v1969_v6 = vmax.bf16 %v2559_v0, %v1937_v43  ;;  %v2156_v10 = vunpack.c.0.s8 %v2155_v30 }
 0x348   : > { %2068 = vmatprep.subr.bf16.mxu0 %v1967_v3 }
 0x349   : > { %2109 = vmatprep.subr.bf16.mxu1 %v1969_v6  ;;  %2069 = vmatpush1.bf16.msra.mxu0 %v1966_v4  ;;  %v2159_v13 = vsub.s32 %v2156_v10, %v2859_v58 }
 0x34a   : > { %2110 = vmatpush1.bf16.msra.mxu1 %v1968_v26 }
 0x34c   : > { %2382 = vmatmul.mubr.msk.bf16.vlgmr.msra.gmra.mrb[100].mxu0 %vm882_vm1, %v3199_v55 }
 0x34d   : > { %2383 = vmatmul.mubr.msk.bf16.vlgmr.msra.gmra.mrb[100].mxu1 %vm882_vm1, %v3199_v55 }
 0x3ff   : > { %v2014_v8 = vpop.f32.mrb[96].mxu0 }
 0x400   : > { %v2015_v14 = vadd.f32 %v2014_v8, %v1975_v7  ;;  %v2055_v9 = vpop.f32.mrb[96].mxu1  ;;  %v2016_v11 = vpop.f32.mrb[97].mxu0 }
 0x401   : > { %v2056_v0 = vadd.f32 %v2055_v9, %v1975_v7  ;;  %v2017_v12 = vadd.f32 %v2016_v11, %v1975_v7  ;;  %v2057_v15 = vpop.f32.mrb[97].mxu1  ;;  %v2018_v16 = vpop.f32.mrb[98].mxu0 }
 0x402   : > { %v2058_v17 = vadd.f32 %v2057_v15, %v1975_v7  ;;  %v2059_v18 = vpop.f32.mrb[98].mxu1  ;;  %v2019_v19 = vpop.f32.mrb[99].mxu0 }
 0x403   : > { %v2152_v20 = vcombine.low %v2015_v14, %v2017_v12  ;;  %v2060_v55 = vpop.f32.mrb[99].mxu1 }
 0x404   : > { %v2153_v22 = vcombine.low %v2056_v0, %v2058_v17 }
 0x405   : > { %v2160_v23 = vrot.slane %v2152_v20, %v2159_v13 }
 0x406   : > { %v2167_v25 = vrot.slane %v2153_v22, %v2159_v13 }
 0x408   : > { %v2168_v24 = vcombine.low %v2160_v23, %v2167_v25 }
 0x40a   : > { %2188 = vst [vmem:[%s269_s17] sm:$0xff] %v2168_v24 }
 0x41f   : > { %v2096_v27 = vpop.f32.mrb[100].mxu0 }
 0x420   : > { %v2097_v28 = vadd.f32 %v2096_v27, %v1975_v7  ;;  %v2137_v29 = vpop.f32.mrb[100].mxu1  ;;  %v2098_v36 = vpop.f32.mrb[101].mxu0 }
 0x421   : > { %v2138_v58 = vadd.f32 %v2137_v29, %v1975_v7  ;;  %v2099_v31 = vadd.f32 %v2098_v36, %v1975_v7  ;;  %v2139_v60 = vpop.f32.mrb[101].mxu1  ;;  %v2100_v32 = vpop.f32.mrb[102].mxu0 }
 0x422   : > { %v2140_v33 = vadd.f32 %v2139_v60, %v1975_v7  ;;  %v2141_v34 = vpop.f32.mrb[102].mxu1  ;;  %v2101_v41 = vpop.f32.mrb[103].mxu0 }
 0x423   : > { %v2169_v35 = vcombine.low %v2097_v28, %v2099_v31  ;;  %v2142_v37 = vpop.f32.mrb[103].mxu1 }
 0x424   : > { %v2170_v38 = vcombine.low %v2138_v58, %v2140_v33 }
 0x425   : > { %v2177_v39 = vrot.slane %v2169_v35, %v2159_v13 }
 0x426   : > { %v2184_v40 = vrot.slane %v2170_v38, %v2159_v13 }
 0x428   : > { %v2185_v42 = vcombine.low %v2177_v39, %v2184_v40 }
 0x42a   : > { %2189 = vst [vmem:[%s269_s17 + $0x8] sm:$0xff] %v2185_v42 }
 0x42b   : > { %2500 = shalt.err (!%p2497_p3)
}
 0x42c   : > { %s2501_s7 = scalar_lea.hbm %s3249_s13, 256  ;;  %s2505_s14 = scalar_lea.hbm %s3299_s6, 512 }
 0x42d   : > { %p2502_p5 = scmp.ne.s32.totalorder %s3249_s13, %s2501_s7  ;;  %p2506_p9 = scmp.lt.u32.totalorder %s3249_s13, %s3299_s6 }
 0x42e   : > { %p2507_p0 = scmp.lt.u32.totalorder %s2505_s14, %s2501_s7  ;;  %p2509_p6 = scmp.lt.u32.totalorder %s2501_s7, %s3249_s13 }
 0x42f   : > { %p2503_p7 = pnand %p2502_p5, %p3307_p11 }
 0x430   : > { %p2508_p2 = por %p2507_p0, %p2506_p9 }
 0x431   : > { %p2504_p8 = pneg %p2503_p7 }
 0x432   : > { %p2510_p12 = por %p2509_p6, %p2508_p2 }
 0x434   : > { %p2511_p13 = pnand %p2510_p12, %p2504_p8 }
 0x436   : > { %2514 = shalt.err (!%p2511_p13)
}
 0x437   : > { %2393 = dma.vmem_to_hbm [thread:$0]  (%p3307_p11), %s3251_s28, 256, %s3249_s13, %s2191_s11  }
 0x438 PF: > { %s2217_s26 = sand.u32 1, %s2541_s21   ;;  %p3308_p4 = scmp.ne.s32.totalorder %s3304_s10, 0 }
 0x439   : > { %p3309_p10 = scmp.ge.s32.totalorder %s2553_s24, 2  ;;  %s2218_s29 = scalar_lea.sflag [#allocation4], %s2217_s26 }
 0x43b   : > { %p2400_p1 = pnand %p3309_p10, %p3308_p4 }
 0x43d   : > { %2536 = dma.done.wait (!%p2400_p1), %s2218_s29, 256  }
 0x43e   : > { %2538 = vsyncadd (!%p2400_p1), %s2218_s29, 4294967040  ;;  %p19_p3 = scmp.ge.s32.totalorder %s2623_s27, 4   ;;  %s3310_s21 = smov %s2545_s22 }
 0x43f   : > { %s3311_s22 = smov %s2549_s23  ;;  %s3312_s23 = smov %s2635_s30 }
 0x440   : > { %s3313_s24 = smov %s2623_s27  ;;  %21 = sbr.rel (!%p19_p3) target bundleno = 5 (0x5), region = 92 }
 0x447   :  { %2223 = vsyncpa [#allocation3], 1 }
 0x448   :  { %2225 = vsyncpa [#allocation3 + $0x1], 1 }
 0x449   :  { %2226 = vsyncpa [#allocation4], 1 }
 0x44a   :  { %2228 = vsyncpa [#allocation4 + $0x1], 1 }

</bundles_post_ra>
